<compile_context>
chip_gen: v6e
topology: v6e:2x2x1
jax: 0.10.0
libtpu: 0.0.40
codegen_flags: <defaults>
</compile_context>

<pallas_src>
import functools

import jax
import jax.numpy as jnp
from jax import lax
from jax.experimental import pallas as pl
from jax.experimental.pallas import tpu as pltpu


def _round_up(x, m):
    return (x + m - 1) // m * m


def _pick_row_tile(M, cap=512):
    """Largest row tile whose padding waste is <= max(M//8, 8) rows."""
    for t in (512, 256, 128, 64, 32, 16, 8):
        if t <= cap and _round_up(M, t) - M <= max(M // 8, 8):
            return t
    return 8


# ----------------------------------------------------------------------------------
# Generic matmul + bias (+ optional ReLU) kernel:  out = relu(x @ w + b)
# Tiled over (M, N), bf16 MXU operands, f32 accumulation, selectable output dtype.
# ----------------------------------------------------------------------------------
def _matmul_bias_kernel(x_ref, w_ref, b_ref, o_ref, *, relu):
    acc = jnp.dot(x_ref[...], w_ref[...], preferred_element_type=jnp.float32)
    acc = acc + b_ref[...]
    if relu:
        acc = jnp.maximum(acc, 0.0)
    o_ref[...] = acc.astype(o_ref.dtype)


def matmul_bias(x, w, b, relu=False, out_dtype=jnp.float32, use_bf16=True):
    """x: (M, K), w: (K, N), b: (N,) -> (M, N) out_dtype."""
    M, K = x.shape
    N = w.shape[1]
    op_dtype = jnp.bfloat16 if use_bf16 else jnp.float32
    x = x.astype(op_dtype)
    w = w.astype(op_dtype)
    b2 = b.reshape(1, N).astype(jnp.float32)

    # Lane tile: prefer 256 (fills one 256x256 MXU pass on v6e/v7x), else 128, else full N.
    if N % 256 == 0:
        tn = 256
    elif N % 128 == 0:
        tn = 128
    else:
        tn = N

    # Row tile chosen to minimize padding waste (avoid ~2x blowup for awkward M).
    tm_eff = _pick_row_tile(M)
    Mp = _round_up(M, tm_eff)
    if Mp != M:
        x = jnp.pad(x, ((0, Mp - M), (0, 0)))

    out = pl.pallas_call(
        functools.partial(_matmul_bias_kernel, relu=relu),
        out_shape=jax.ShapeDtypeStruct((Mp, N), out_dtype),
        grid=(Mp // tm_eff, N // tn),
        in_specs=[
            pl.BlockSpec((tm_eff, K), lambda i, j: (i, 0)),
            pl.BlockSpec((K, tn), lambda i, j: (0, j)),
            pl.BlockSpec((1, tn), lambda i, j: (0, j)),
        ],
        out_specs=pl.BlockSpec((tm_eff, tn), lambda i, j: (i, j)),
        compiler_params=pltpu.CompilerParams(
            dimension_semantics=("parallel", "parallel")),
    )(x, w, b2)
    return out[:M] if Mp != M else out


# ----------------------------------------------------------------------------------
# Attention decoder kernel: full teacher-forced decode loop for one
# (batch-tile, candidate) grid cell.  (h, c) of the LSTMCell are carried in VMEM
# scratch across decode steps.  Hidden size is padded to HP=128 lanes; the padded
# lanes stay exactly zero (zero-padded weights/bias keep them at 0).
#   * MXU operands (features, weights, embeddings, h at dot sites) are bf16,
#     accumulation and elementwise math are f32 (portable to v5e).
#   * Attention score / context use VPU multiplies + XLU reductions instead of
#     size-1-M MXU dot_generals.
# ----------------------------------------------------------------------------------
def _attn_decode_kernel(bH_ref, bHp_ref, emb_ref,
                        h2h_w_ref, h2h_b_ref, score_w_ref,
                        w_ih_x_ref, w_hh_ref, bias_ref,
                        out_ref, h_sc, c_sc):
    tb, T, C = bH_ref.shape
    HP = h_sc.shape[1]
    S = emb_ref.shape[0]

    # Loop-invariant small vectors / broadcasts hoisted out of the decode loop.
    h2h_b = h2h_b_ref[...]                                  # (1, HP) f32
    bias = bias_ref[...]                                    # (1, 4*HP) f32
    score_w = score_w_ref[...].reshape(1, 1, HP)            # (1, 1, HP) f32

    h_sc[...] = jnp.zeros_like(h_sc)
    c_sc[...] = jnp.zeros_like(c_sc)

    def step(i, carry):
        h_prev = h_sc[...]                                  # (tb, HP) f32
        c_prev = c_sc[...]                                  # (tb, HP) f32
        h_bf = h_prev.astype(jnp.bfloat16)

        # prev_hidden_proj = h2h(h_prev)  (bf16 MXU, f32 accumulation)
        hp = jnp.dot(h_bf, h2h_w_ref[...],
                     preferred_element_type=jnp.float32) + h2h_b          # (tb, HP)
        t_act = jnp.tanh(bHp_ref[...].astype(jnp.float32) + hp[:, None, :])  # (tb, T, HP)

        # attention scores: VPU multiply + lane reduce over HP (no size-1 MXU pass)
        e = jnp.sum(t_act * score_w, axis=-1)                             # (tb, T)
        alpha = jax.nn.softmax(e, axis=-1)                                # (tb, T)

        # context: VPU multiply + sublane reduce over T
        ctx = jnp.sum(alpha[:, :, None] * bH_ref[...].astype(jnp.float32),
                      axis=1)                                             # (tb, C)

        # LSTMCell on concat([context, char]) -- the char one-hot matmul is a
        # pre-gathered embedding row (emb_ref[i]); biases b_ih+b_hh pre-combined.
        gates = (jnp.dot(ctx.astype(jnp.bfloat16), w_ih_x_ref[...],
                         preferred_element_type=jnp.float32)
                 + jnp.dot(h_bf, w_hh_ref[...],
                           preferred_element_type=jnp.float32)
                 + emb_ref[i].astype(jnp.float32) + bias)                 # (tb, 4*HP)

        i_g = jax.nn.sigmoid(gates[:, 0 * HP:1 * HP])
        f_g = jax.nn.sigmoid(gates[:, 1 * HP:2 * HP])
        g_g = jnp.tanh(gates[:, 2 * HP:3 * HP])
        o_g = jax.nn.sigmoid(gates[:, 3 * HP:4 * HP])

        c_new = f_g * c_prev + i_g * g_g
        h_new = o_g * jnp.tanh(c_new)

        h_sc[...] = h_new
        c_sc[...] = c_new
        out_ref[i] = h_new.astype(out_ref.dtype)                          # (tb, HP)
        return carry

    lax.fori_loop(0, S, step, 0)


def _pick_tb(B):
    for t in (32, 16, 8):
        if B % t == 0:
            return t
    return B


def attention_decode(batch_H, batch_H_proj, emb, p):
    """batch_H: (B,T,C) bf16, batch_H_proj: (B,T,HP) bf16, emb: (num_cand,S,B,4HP) bf16
    -> hiddens (num_cand, S, B, HP) bf16."""
    B, T, C = batch_H.shape
    num_cand, S, _, G4 = emb.shape
    HP = G4 // 4
    tb = _pick_tb(B)

    h2h_w = p["h2h_w_t_p"].astype(jnp.bfloat16)
    w_ih_x = p["w_ih_x_t_p"].astype(jnp.bfloat16)
    w_hh = p["w_hh_t_p"].astype(jnp.bfloat16)

    def const_spec(shape):
        nd = len(shape)
        return pl.BlockSpec(shape, lambda bi, ci, _nd=nd: (0,) * _nd)

    # Grid: candidate is the fastest axis -> the candidate-invariant bH / bHp blocks
    # keep the same block index across consecutive steps, so Pallas skips their
    # re-DMA (the candidate broadcast is never materialized).
    grid = (B // tb, num_cand)

    out = pl.pallas_call(
        _attn_decode_kernel,
        out_shape=jax.ShapeDtypeStruct((num_cand, S, B, HP), jnp.bfloat16),
        grid=grid,
        in_specs=[
            pl.BlockSpec((tb, T, C), lambda bi, ci: (bi, 0, 0)),       # candidate-invariant
            pl.BlockSpec((tb, T, HP), lambda bi, ci: (bi, 0, 0)),      # candidate-invariant
            pl.BlockSpec((None, S, tb, 4 * HP), lambda bi, ci: (ci, 0, bi, 0)),
            const_spec((HP, HP)),
            const_spec((1, HP)),
            const_spec((1, HP)),
            const_spec((C, 4 * HP)),
            const_spec((HP, 4 * HP)),
            const_spec((1, 4 * HP)),
        ],
        out_specs=pl.BlockSpec((None, S, tb, HP), lambda bi, ci: (ci, 0, bi, 0)),
        scratch_shapes=[pltpu.VMEM((tb, HP), jnp.float32),
                        pltpu.VMEM((tb, HP), jnp.float32)],
        compiler_params=pltpu.CompilerParams(
            dimension_semantics=("parallel", "parallel"),
            vmem_limit_bytes=32 * 1024 * 1024),
    )(batch_H, batch_H_proj, emb,
      h2h_w, p["h2h_b_p"], p["score_w_p"],
      w_ih_x, w_hh, p["lstm_bias_p"])
    return out


# ----------------------------------------------------------------------------------
# CrossEntropyLoss(ignore_index=0, reduction='none') kernel, row-tiled,
# masking the zero-padded class columns (col >= k_real).
# ----------------------------------------------------------------------------------
def _ce_kernel(logits_ref, tgt_ref, loss_ref, *, k_real):
    logits = logits_ref[...]                               # (tm, Kp) f32
    tgt = tgt_ref[...]                                     # (tm, 1) int32
    col = lax.broadcasted_iota(jnp.int32, logits.shape, 1)
    lg = jnp.where(col < k_real, logits, -1e30)            # mask padded classes
    m = jnp.max(lg, axis=1, keepdims=True)
    lse = jnp.log(jnp.sum(jnp.exp(lg - m), axis=1, keepdims=True)) + m
    picked = jnp.sum(jnp.where(col == tgt, lg, 0.0), axis=1, keepdims=True)
    loss = lse - picked
    loss_ref[...] = jnp.where(tgt != 0, loss, 0.0)         # ignore_index=0


def cross_entropy_none(logits, targets, k_real, tm=256):
    """logits: (N, Kp) f32 (Kp lane-padded), targets: (N,) int32 -> (N,) per-element loss."""
    N, Kp = logits.shape
    tm_eff = _pick_row_tile(N, cap=tm)                     # VMEM-safe tile (v7x 64 MiB budget)
    Np = _round_up(N, tm_eff)
    lg = logits.astype(jnp.float32)
    tg = targets.reshape(N, 1).astype(jnp.int32)
    if Np != N:
        lg = jnp.pad(lg, ((0, Np - N), (0, 0)))
        tg = jnp.pad(tg, ((0, Np - N), (0, 0)))            # padded rows -> target 0 -> ignored
    out = pl.pallas_call(
        functools.partial(_ce_kernel, k_real=k_real),
        out_shape=jax.ShapeDtypeStruct((Np, 1), jnp.float32),
        grid=(Np // tm_eff,),
        in_specs=[pl.BlockSpec((tm_eff, Kp), lambda i: (i, 0)),
                  pl.BlockSpec((tm_eff, 1), lambda i: (i, 0))],
        out_specs=pl.BlockSpec((tm_eff, 1), lambda i: (i, 0)),
        compiler_params=pltpu.CompilerParams(dimension_semantics=("parallel",)),
    )(lg, tg)
    return out[:N, 0]


# ----------------------------------------------------------------------------------
# Feature extraction (ResNet_FeatureExtractor approximation)
# ----------------------------------------------------------------------------------
def _im2col_nchw(x, k=3, stride=2, pad=1):
    B, C, H, W = x.shape
    xp = jnp.pad(x, ((0, 0), (0, 0), (pad, pad), (pad, pad)))
    Hp, Wp = H + 2 * pad, W + 2 * pad
    Ho = (Hp - k) // stride + 1
    Wo = (Wp - k) // stride + 1
    cols = []
    for di in range(k):
        for dj in range(k):
            cols.append(xp[:, :, di:di + stride * Ho:stride, dj:dj + stride * Wo:stride])
    p = jnp.stack(cols, axis=2)                            # (B, C, k*k, Ho, Wo)
    p = p.transpose(0, 3, 4, 1, 2).reshape(B * Ho * Wo, C * k * k)
    return p, Ho, Wo


def feature_extraction(x_nchw, conv_w, conv_b):
    # TODO(synk): ResNet_FeatureExtractor is not defined in the reference file; approximated
    # by a single 3x3 stride-2 conv + ReLU.  im2col runs in bf16 (halves the 9x expanded
    # HBM copy); fusing it via an overlapping-window BlockSpec would remove it entirely.
    patches, Ho, Wo = _im2col_nchw(x_nchw.astype(jnp.bfloat16), k=3, stride=2, pad=1)
    Cout = conv_w.shape[0]
    w2 = conv_w.reshape(Cout, -1).T                        # (Cin*9, Cout)
    K = w2.shape[0]
    Kp = _round_up(K, 32)                                  # sublane-align contraction dim (bf16 packing)
    if Kp != K:
        patches = jnp.pad(patches, ((0, 0), (0, Kp - K)))
        w2 = jnp.pad(w2, ((0, Kp - K), (0, 0)))
    feat = matmul_bias(patches, w2, conv_b, relu=True,
                       out_dtype=jnp.bfloat16)             # (B*Ho*Wo, Cout) bf16
    B = x_nchw.shape[0]
    return feat.reshape(B, Ho, Wo, Cout), Ho, Wo           # NHWC


# ----------------------------------------------------------------------------------
# Full Attn_model forward (is_train=True branch).  All candidates decoded by ONE
# decode kernel (grid over batch tiles x candidates), one generator matmul, one CE.
# ----------------------------------------------------------------------------------
def attn_model_forward(input_nchw, text_list, distances, params, nclass):
    feat_nhwc, Ho, Wo = feature_extraction(input_nchw, params["conv_w"], params["conv_b"])
    B = input_nchw.shape[0]
    Cout = feat_nhwc.shape[-1]
    T = Ho * Wo
    # matches permute(0,2,3,1).view(b, h*w, c)
    visual_feature = feat_nhwc.reshape(B, T, Cout)                      # bf16
    HP = params["h2h_w_t_p"].shape[0]
    NCP = params["gen_w_t_p"].shape[1]

    # i2h(batch_H) is candidate-independent: computed exactly once (hoisted), bf16 out.
    bHp = matmul_bias(visual_feature.reshape(B * T, Cout),
                      params["i2h_w_t_p"],
                      jnp.zeros((HP,), jnp.float32),
                      out_dtype=jnp.bfloat16).reshape(B, T, HP)

    num_cand = len(text_list)
    text_all = jnp.stack(text_list)                                     # (num_cand, B, L+1)
    S = text_all.shape[-1] - 1
    text_in = text_all[:, :, :-1]                                       # (num_cand, B, S)
    targets = text_all[:, :, 1:]                                        # (num_cand, B, S)

    # one-hot @ w_ih_e replaced by a row gather of the gate-padded embedding rows (bf16).
    emb = jnp.take(params["w_ih_e_t_p"].astype(jnp.bfloat16),
                   text_in.transpose(0, 2, 1), axis=0)                  # (num_cand, S, B, 4*HP)

    # Decode: output stays in (cand, S, B, HP) order -> no full-tensor transpose.
    hiddens = attention_decode(visual_feature, bHp, emb, params)        # (num_cand, S, B, HP) bf16

    logits = matmul_bias(hiddens.reshape(num_cand * S * B, HP),
                         params["gen_w_t_p"], params["gen_b_p"])        # (num_cand*S*B, NCP) f32

    # Targets re-ordered (tiny int32) to the kernel-friendly (cand, s, b) row order.
    tgt_csb = targets.transpose(0, 2, 1).reshape(-1)
    cost = cross_entropy_none(logits, tgt_csb, nclass)                  # (num_cand*S*B,)
    cost_csb = cost.reshape(num_cand, S, B)
    cost_all = cost_csb.transpose(0, 2, 1).reshape(num_cand, B * S)     # reference (b, s) flat order

    preds = (logits.reshape(num_cand, S, B, NCP)[0, :, :, :nclass]
             .transpose(1, 0, 2))                                       # (B, S, nclass), candidate 0
    total_cost = cost_all[0]                                            # candidate 0 CE, as in reference
    cn = 1.0 / cost_all                                                 # (num_cand, B*S)

    distances = jnp.asarray(distances, jnp.float32)                     # (num_cand, B)
    dict_loss = []
    for b in range(B):
        cn_per_image = jax.nn.softmax(cn[:, b], axis=0)                             # (num_cand,)
        _dist_per_image = jax.nn.softmax(1.0 / (distances[:, b] + 0.1), axis=0)     # unused, as in reference
        inp = cn_per_image[None, :]                                                 # (1, num_cand)
        tgt = distances                                                             # reference passes full `distances`
        # nn.KLDivLoss(reduction='batchmean')(inp, tgt) = sum(tgt*(log(tgt)-inp)) / inp.shape[0]
        kl = jnp.sum(tgt * (jnp.log(tgt) - inp)) / inp.shape[0]
        dict_loss.append(kl)

    # TODO(synk): reference does `total_cost += dict_loss` (tensor += python list of scalars),
    # which is ill-typed in PyTorch; approximated by adding the summed dict losses.
    total_cost = total_cost + jnp.sum(jnp.stack(dict_loss))
    return preds, total_cost


# ----------------------------------------------------------------------------------
# Deterministic parameter construction (raw shapes per the reference __init__),
# plus lane-padded / pre-transposed kernel-ready copies.
# ----------------------------------------------------------------------------------
def _pad_gate_cols(w_t, nh, hp):
    """(in_dim, 4*nh) -> (in_dim, 4*hp): per-gate zero padding of the output columns."""
    # TODO(synk): when nh << 128 this carries 4x zero columns per gate; pack 4*nh to one
    # 128-lane block + in-kernel gate split if production nh is small and perf-critical.
    in_dim = w_t.shape[0]
    return jnp.pad(w_t.reshape(in_dim, 4, nh),
                   ((0, 0), (0, 0), (0, hp - nh))).reshape(in_dim, 4 * hp)


def _pad_gate_vec(v, nh, hp):
    return jnp.pad(v.reshape(4, nh), ((0, 0), (0, hp - nh))).reshape(4 * hp)


def init_params(key, nc, cout, nclass, nh):
    ks = jax.random.split(key, 12)
    s = 0.05
    conv_w = jax.random.normal(ks[0], (cout, nc, 3, 3), jnp.float32) * s
    conv_b = jax.random.normal(ks[1], (cout,), jnp.float32) * s
    i2h_w = jax.random.normal(ks[2], (nh, cout), jnp.float32) * s          # Linear(cout, nh, bias=False)
    h2h_w = jax.random.normal(ks[3], (nh, nh), jnp.float32) * s            # Linear(nh, nh)
    h2h_b = jax.random.normal(ks[4], (nh,), jnp.float32) * s
    score_w = jax.random.normal(ks[5], (1, nh), jnp.float32) * s           # Linear(nh, 1, bias=False)
    w_ih = jax.random.normal(ks[6], (4 * nh, cout + nclass), jnp.float32) * s  # LSTMCell
    b_ih = jax.random.normal(ks[7], (4 * nh,), jnp.float32) * s
    w_hh = jax.random.normal(ks[8], (4 * nh, nh), jnp.float32) * s
    b_hh = jax.random.normal(ks[9], (4 * nh,), jnp.float32) * s
    gen_w = jax.random.normal(ks[10], (nclass, nh), jnp.float32) * s       # Linear(nh, nclass)
    gen_b = jax.random.normal(ks[11], (nclass,), jnp.float32) * s

    HP = _round_up(nh, 128)        # hidden dim padded to the 128-lane width
    NCP = _round_up(nclass, 128)   # class dim padded to the 128-lane width

    def pad_cols(a, to):
        return jnp.pad(a, ((0, 0), (0, to - a.shape[1])))

    def pad_rows(a, to):
        return jnp.pad(a, ((0, to - a.shape[0]), (0, 0)))

    params = dict(
        conv_w=conv_w, conv_b=conv_b,
        # Kernel-ready, lane-padded & pre-transposed (y = x @ W form).  Padded weight
        # columns/rows are zero, so the padded hidden lanes stay exactly zero.
        i2h_w_t_p=pad_cols(i2h_w.T, HP),                                   # (cout, HP)
        h2h_w_t_p=pad_cols(pad_rows(h2h_w.T, HP), HP),                     # (HP, HP)
        h2h_b_p=jnp.pad(h2h_b, (0, HP - nh)).reshape(1, HP),
        score_w_p=pad_cols(score_w, HP),                                   # (1, HP)
        w_ih_x_t_p=_pad_gate_cols(w_ih[:, :cout].T, nh, HP),               # (cout, 4*HP)
        w_ih_e_t_p=_pad_gate_cols(w_ih[:, cout:].T, nh, HP),               # (nclass, 4*HP)
        w_hh_t_p=_pad_gate_cols(pad_rows(w_hh.T, HP), nh, HP),             # (HP, 4*HP)
        lstm_bias_p=_pad_gate_vec(b_ih + b_hh, nh, HP).reshape(1, 4 * HP),
        gen_w_t_p=pad_cols(pad_rows(gen_w.T, HP), NCP),                    # (HP, NCP)
        gen_b_p=jnp.pad(gen_b, (0, NCP - nclass)),                         # (NCP,)
    )
    return params


if __name__ == "__main__":
    # Small, module-consistent shapes.
    B = 2                 # batch
    NC = 3                # input channels (nc)
    IMG_H, IMG_W = 8, 16  # imgH, imgW
    COUT = 512            # FeatureExtraction_output (fixed to 512 in the module)
    NCLASS = 16           # nclass
    NH = 32               # nh (hidden size)
    NUM_CAND = 2          # number of candidate texts (== B so the reference KL broadcast is valid)
    L = 5                 # decode steps (text has L+1 tokens)

    key = jax.random.PRNGKey(0)
    k_img, k_txt, k_dst, k_par = jax.random.split(key, 4)

    x = jax.random.normal(k_img, (B, NC, IMG_H, IMG_W), jnp.float32)     # NCHW, like PyTorch
    # tokens in [1, NCLASS) so ignore_index=0 never triggers (keeps 1/cost finite, as in training data)
    text = jax.random.randint(k_txt, (NUM_CAND, B, L + 1), 1, NCLASS, dtype=jnp.int32)
    text_list = [text[i] for i in range(NUM_CAND)]
    distances = jax.random.uniform(k_dst, (NUM_CAND, B), jnp.float32, 0.5, 2.0)

    params = init_params(k_par, NC, COUT, NCLASS, NH)

    fwd = jax.jit(attn_model_forward, static_argnums=(4,))
    preds, total_cost = fwd(x, text_list, distances, params, NCLASS)
    preds = jax.block_until_ready(preds)
    total_cost = jax.block_until_ready(total_cost)

    assert preds.shape == (B, L, NCLASS)
    assert total_cost.shape == (B * L,)
    assert bool(jnp.all(jnp.isfinite(preds)))
    assert bool(jnp.all(jnp.isfinite(total_cost)))
    print("KERNEL_OK")
</pallas_src>

<mosaic_0001>
module attributes {stable_mosaic.version = 11 : i64} {
  func.func @_matmul_bias_kernel(%arg0: i32, %arg1: i32, %arg2: memref<64x32xbf16, #tpu.memory_space<vmem>>, %arg3: memref<32x256xbf16, #tpu.memory_space<vmem>>, %arg4: memref<1x256xf32, #tpu.memory_space<vmem>>, %arg5: memref<64x256xbf16, #tpu.memory_space<vmem>>) attributes {dimension_semantics = [#tpu.dimension_semantics<parallel>, #tpu.dimension_semantics<parallel>], iteration_bounds = array<i64: 1, 2>, scalar_prefetch = 0 : i64, scratch_operands = 0 : i64, tpu.core_type = #tpu.core_type<tc>, window_params = [{transform_indices = @transform_0, window_bounds = array<i64: 64, 32>}, {transform_indices = @transform_1, window_bounds = array<i64: 32, 256>}, {transform_indices = @transform_2, window_bounds = array<i64: 1, 256>}, {transform_indices = @transform_3, window_bounds = array<i64: 64, 256>}]} {
    %c0 = arith.constant 0 : index
    %c0_0 = arith.constant 0 : index
    %0 = vector.load %arg2[%c0, %c0_0] : memref<64x32xbf16, #tpu.memory_space<vmem>>, vector<64x32xbf16>
    %c0_1 = arith.constant 0 : index
    %c0_2 = arith.constant 0 : index
    %1 = vector.load %arg3[%c0_1, %c0_2] : memref<32x256xbf16, #tpu.memory_space<vmem>>, vector<32x256xbf16>
    %cst = arith.constant dense<0.000000e+00> : vector<64x256xf32>
    %2 = tpu.matmul %0, %1, %cst {dimension_numbers = #tpu.dot_dimension_numbers<[1], [0], [0], [1], [0, 0, 1, 1], [], []>} : vector<64x32xbf16>, vector<32x256xbf16>, vector<64x256xf32> -> vector<64x256xf32>
    %c0_3 = arith.constant 0 : index
    %c0_4 = arith.constant 0 : index
    %3 = vector.load %arg4[%c0_3, %c0_4] : memref<1x256xf32, #tpu.memory_space<vmem>>, vector<1x256xf32>
    %4 = vector.broadcast %3 : vector<1x256xf32> to vector<64x256xf32>
    %5 = arith.addf %2, %4 : vector<64x256xf32>
    %cst_5 = arith.constant 0.000000e+00 : f32
    %6 = vector.broadcast %cst_5 : f32 to vector<64x256xf32>
    %7 = arith.maximumf %5, %6 : vector<64x256xf32>
    %8 = arith.truncf %7 : vector<64x256xf32> to vector<64x256xbf16>
    %c0_6 = arith.constant 0 : index
    %c0_7 = arith.constant 0 : index
    %9 = vector.load %arg5[%c0_6, %c0_7] : memref<64x256xbf16, #tpu.memory_space<vmem>>, vector<64x256xbf16>
    tpu.vector_store %arg5[%c0_6, %c0_7], %8 {strides = array<i32>} : memref<64x256xbf16, #tpu.memory_space<vmem>>, vector<64x256xbf16>,
    return
  }
  func.func @transform_0(%arg0: i32, %arg1: i32) -> (i32, i32) {
    %c0_i32 = arith.constant 0 : i32
    %c0_i32_0 = arith.constant 0 : i32
    return %arg0, %c0_i32 : i32, i32
  }
  func.func @transform_1(%arg0: i32, %arg1: i32) -> (i32, i32) {
    %c0_i32 = arith.constant 0 : i32
    %c0_i32_0 = arith.constant 0 : i32
    return %c0_i32, %arg1 : i32, i32
  }
  func.func @transform_2(%arg0: i32, %arg1: i32) -> (i32, i32) {
    %c0_i32 = arith.constant 0 : i32
    %c0_i32_0 = arith.constant 0 : i32
    return %c0_i32, %arg1 : i32, i32
  }
  func.func @transform_3(%arg0: i32, %arg1: i32) -> (i32, i32) {
    %c0_i32 = arith.constant 0 : i32
    return %arg0, %arg1 : i32, i32
  }
}

module attributes {stable_mosaic.version = 11 : i64} {
  func.func @_matmul_bias_kernel(%arg0: i32, %arg1: i32, %arg2: memref<64x512xbf16, #tpu.memory_space<vmem>>, %arg3: memref<512x128xbf16, #tpu.memory_space<vmem>>, %arg4: memref<1x128xf32, #tpu.memory_space<vmem>>, %arg5: memref<64x128xbf16, #tpu.memory_space<vmem>>) attributes {dimension_semantics = [#tpu.dimension_semantics<parallel>, #tpu.dimension_semantics<parallel>], iteration_bounds = array<i64: 1, 1>, scalar_prefetch = 0 : i64, scratch_operands = 0 : i64, tpu.core_type = #tpu.core_type<tc>, window_params = [{transform_indices = @transform_0, window_bounds = array<i64: 64, 512>}, {transform_indices = @transform_1, window_bounds = array<i64: 512, 128>}, {transform_indices = @transform_2, window_bounds = array<i64: 1, 128>}, {transform_indices = @transform_3, window_bounds = array<i64: 64, 128>}]} {
    %c0 = arith.constant 0 : index
    %c0_0 = arith.constant 0 : index
    %0 = vector.load %arg2[%c0, %c0_0] : memref<64x512xbf16, #tpu.memory_space<vmem>>, vector<64x512xbf16>
    %c0_1 = arith.constant 0 : index
    %c0_2 = arith.constant 0 : index
    %1 = vector.load %arg3[%c0_1, %c0_2] : memref<512x128xbf16, #tpu.memory_space<vmem>>, vector<512x128xbf16>
    %cst = arith.constant dense<0.000000e+00> : vector<64x128xf32>
    %2 = tpu.matmul %0, %1, %cst {dimension_numbers = #tpu.dot_dimension_numbers<[1], [0], [0], [1], [0, 0, 1, 1], [], []>} : vector<64x512xbf16>, vector<512x128xbf16>, vector<64x128xf32> -> vector<64x128xf32>
    %c0_3 = arith.constant 0 : index
    %c0_4 = arith.constant 0 : index
    %3 = vector.load %arg4[%c0_3, %c0_4] : memref<1x128xf32, #tpu.memory_space<vmem>>, vector<1x128xf32>
    %4 = vector.broadcast %3 : vector<1x128xf32> to vector<64x128xf32>
    %5 = arith.addf %2, %4 : vector<64x128xf32>
    %6 = arith.truncf %5 : vector<64x128xf32> to vector<64x128xbf16>
    %c0_5 = arith.constant 0 : index
    %c0_6 = arith.constant 0 : index
    %7 = vector.load %arg5[%c0_5, %c0_6] : memref<64x128xbf16, #tpu.memory_space<vmem>>, vector<64x128xbf16>
    tpu.vector_store %arg5[%c0_5, %c0_6], %6 {strides = array<i32>} : memref<64x128xbf16, #tpu.memory_space<vmem>>, vector<64x128xbf16>,
    return
  }
  func.func @transform_0(%arg0: i32, %arg1: i32) -> (i32, i32) {
    %c0_i32 = arith.constant 0 : i32
    %c0_i32_0 = arith.constant 0 : i32
    return %arg0, %c0_i32 : i32, i32
  }
  func.func @transform_1(%arg0: i32, %arg1: i32) -> (i32, i32) {
    %c0_i32 = arith.constant 0 : i32
    %c0_i32_0 = arith.constant 0 : i32
    return %c0_i32, %arg1 : i32, i32
  }
  func.func @transform_2(%arg0: i32, %arg1: i32) -> (i32, i32) {
    %c0_i32 = arith.constant 0 : i32
    %c0_i32_0 = arith.constant 0 : i32
    return %c0_i32, %arg1 : i32, i32
  }
  func.func @transform_3(%arg0: i32, %arg1: i32) -> (i32, i32) {
    %c0_i32 = arith.constant 0 : i32
    return %arg0, %arg1 : i32, i32
  }
}

module attributes {stable_mosaic.version = 11 : i64} {
  func.func @_attn_decode_kernel(%arg0: i32, %arg1: i32, %arg2: memref<2x32x512xbf16, #tpu.memory_space<vmem>>, %arg3: memref<2x32x128xbf16, #tpu.memory_space<vmem>>, %arg4: memref<1x5x2x512xbf16, #tpu.memory_space<vmem>>, %arg5: memref<128x128xbf16, #tpu.memory_space<vmem>>, %arg6: memref<1x128xf32, #tpu.memory_space<vmem>>, %arg7: memref<1x128xf32, #tpu.memory_space<vmem>>, %arg8: memref<512x512xbf16, #tpu.memory_space<vmem>>, %arg9: memref<128x512xbf16, #tpu.memory_space<vmem>>, %arg10: memref<1x512xf32, #tpu.memory_space<vmem>>, %arg11: memref<1x5x2x128xbf16, #tpu.memory_space<vmem>>, %arg12: memref<2x128xf32, #tpu.memory_space<vmem>>, %arg13: memref<2x128xf32, #tpu.memory_space<vmem>>) attributes {dimension_semantics = [#tpu.dimension_semantics<parallel>, #tpu.dimension_semantics<parallel>], iteration_bounds = array<i64: 1, 2>, scalar_prefetch = 0 : i64, scratch_operands = 2 : i64, tpu.core_type = #tpu.core_type<tc>, window_params = [{transform_indices = @transform_0, window_bounds = array<i64: 2, 32, 512>}, {transform_indices = @transform_1, window_bounds = array<i64: 2, 32, 128>}, {transform_indices = @transform_2, window_bounds = array<i64: 1, 5, 2, 512>}, {pipeline_mode = #tpu.pipeline_mode<synchronous>, transform_indices = @transform_3, window_bounds = array<i64: 128, 128>}, {pipeline_mode = #tpu.pipeline_mode<synchronous>, transform_indices = @transform_4, window_bounds = array<i64: 1, 128>}, {pipeline_mode = #tpu.pipeline_mode<synchronous>, transform_indices = @transform_5, window_bounds = array<i64: 1, 128>}, {pipeline_mode = #tpu.pipeline_mode<synchronous>, transform_indices = @transform_6, window_bounds = array<i64: 512, 512>}, {pipeline_mode = #tpu.pipeline_mode<synchronous>, transform_indices = @transform_7, window_bounds = array<i64: 128, 512>}, {pipeline_mode = #tpu.pipeline_mode<synchronous>, transform_indices = @transform_8, window_bounds = array<i64: 1, 512>}, {transform_indices = @transform_9, window_bounds = array<i64: 1, 5, 2, 128>}]} {
    %c0 = arith.constant 0 : index
    %c0_0 = arith.constant 0 : index
    %0 = vector.load %arg6[%c0, %c0_0] : memref<1x128xf32, #tpu.memory_space<vmem>>, vector<1x128xf32>
    %c0_1 = arith.constant 0 : index
    %c0_2 = arith.constant 0 : index
    %1 = vector.load %arg10[%c0_1, %c0_2] : memref<1x512xf32, #tpu.memory_space<vmem>>, vector<1x512xf32>
    %c0_3 = arith.constant 0 : index
    %c0_4 = arith.constant 0 : index
    %2 = vector.load %arg7[%c0_3, %c0_4] : memref<1x128xf32, #tpu.memory_space<vmem>>, vector<1x128xf32>
    %3 = vector.shape_cast %2 : vector<1x128xf32> to vector<1x1x128xf32>
    %cst = arith.constant 0.000000e+00 : f32
    %4 = vector.broadcast %cst : f32 to vector<2x128xf32>
    %c0_5 = arith.constant 0 : index
    %c0_6 = arith.constant 0 : index
    %5 = vector.load %arg12[%c0_5, %c0_6] : memref<2x128xf32, #tpu.memory_space<vmem>>, vector<2x128xf32>
    tpu.vector_store %arg12[%c0_5, %c0_6], %4 {strides = array<i32>} : memref<2x128xf32, #tpu.memory_space<vmem>>, vector<2x128xf32>,
    %cst_7 = arith.constant 0.000000e+00 : f32
    %6 = vector.broadcast %cst_7 : f32 to vector<2x128xf32>
    %c0_8 = arith.constant 0 : index
    %c0_9 = arith.constant 0 : index
    %7 = vector.load %arg13[%c0_8, %c0_9] : memref<2x128xf32, #tpu.memory_space<vmem>>, vector<2x128xf32>
    tpu.vector_store %arg13[%c0_8, %c0_9], %6 {strides = array<i32>} : memref<2x128xf32, #tpu.memory_space<vmem>>, vector<2x128xf32>,
    %c0_i32 = arith.constant 0 : i32
    %c5_i32 = arith.constant 5 : i32
    %8 = arith.addi %c0_i32, %c5_i32 : i32
    %c1_i32 = arith.constant 1 : i32
    scf.for %arg14 = %c0_i32 to %8 step %c1_i32  : i32 {
      %c0_11 = arith.constant 0 : index
      %c0_12 = arith.constant 0 : index
      %9 = vector.load %arg12[%c0_11, %c0_12] : memref<2x128xf32, #tpu.memory_space<vmem>>, vector<2x128xf32>
      %c0_13 = arith.constant 0 : index
      %c0_14 = arith.constant 0 : index
      %10 = vector.load %arg13[%c0_13, %c0_14] : memref<2x128xf32, #tpu.memory_space<vmem>>, vector<2x128xf32>
      %11 = arith.truncf %9 : vector<2x128xf32> to vector<2x128xbf16>
      %c0_15 = arith.constant 0 : index
      %c0_16 = arith.constant 0 : index
      %12 = vector.load %arg5[%c0_15, %c0_16] : memref<128x128xbf16, #tpu.memory_space<vmem>>, vector<128x128xbf16>
      %cst_17 = arith.constant dense<0.000000e+00> : vector<2x128xf32>
      %13 = tpu.matmul %11, %12, %cst_17 {dimension_numbers = #tpu.dot_dimension_numbers<[1], [0], [0], [1], [0, 0, 1, 1], [], []>} : vector<2x128xbf16>, vector<128x128xbf16>, vector<2x128xf32> -> vector<2x128xf32>
      %14 = vector.broadcast %0 : vector<1x128xf32> to vector<2x128xf32>
      %15 = arith.addf %13, %14 : vector<2x128xf32>
      %c0_18 = arith.constant 0 : index
      %c0_19 = arith.constant 0 : index
      %c0_20 = arith.constant 0 : index
      %16 = vector.load %arg3[%c0_18, %c0_19, %c0_20] : memref<2x32x128xbf16, #tpu.memory_space<vmem>>, vector<2x32x128xbf16>
      %17 = arith.extf %16 : vector<2x32x128xbf16> to vector<2x32x128xf32>
      %18 = vector.shape_cast %15 : vector<2x128xf32> to vector<2x1x128xf32>
      %19 = vector.broadcast %18 : vector<2x1x128xf32> to vector<2x32x128xf32>
      %20 = arith.addf %17, %19 : vector<2x32x128xf32>
      %21 = math.tanh %20 : vector<2x32x128xf32>
      %22 = vector.broadcast %3 : vector<1x1x128xf32> to vector<2x32x128xf32>
      %23 = arith.mulf %21, %22 : vector<2x32x128xf32>
      %cst_21 = arith.constant dense<0.000000e+00> : vector<2x32xf32>
      %24 = vector.multi_reduction <add>, %23, %cst_21 [2] : vector<2x32x128xf32> to vector<2x32xf32>
      %cst_22 = arith.constant dense<0xFF800000> : vector<2xf32>
      %25 = vector.multi_reduction <maximumf>, %24, %cst_22 [1] : vector<2x32xf32> to vector<2xf32>
      %cst_23 = arith.constant 0xFF800000 : f32
      %26 = vector.broadcast %cst_23 : f32 to vector<2xf32>
      %27 = arith.maximumf %26, %25 : vector<2xf32>
      %28 = vector.shape_cast %27 : vector<2xf32> to vector<2x1xf32>
      %29 = vector.broadcast %28 : vector<2x1xf32> to vector<2x32xf32>
      %30 = arith.subf %24, %29 : vector<2x32xf32>
      %31 = math.exp %30 : vector<2x32xf32>
      %cst_24 = arith.constant dense<0.000000e+00> : vector<2xf32>
      %32 = vector.multi_reduction <add>, %31, %cst_24 [1] : vector<2x32xf32> to vector<2xf32>
      %33 = vector.shape_cast %32 : vector<2xf32> to vector<2x1xf32>
      %34 = vector.broadcast %33 : vector<2x1xf32> to vector<2x32xf32>
      %35 = arith.divf %31, %34 : vector<2x32xf32>
      %36 = vector.shape_cast %35 : vector<2x32xf32> to vector<2x32x1xf32>
      %c0_25 = arith.constant 0 : index
      %c0_26 = arith.constant 0 : index
      %c0_27 = arith.constant 0 : index
      %37 = vector.load %arg2[%c0_25, %c0_26, %c0_27] : memref<2x32x512xbf16, #tpu.memory_space<vmem>>, vector<2x32x512xbf16>
      %38 = arith.extf %37 : vector<2x32x512xbf16> to vector<2x32x512xf32>
      %39 = vector.broadcast %36 : vector<2x32x1xf32> to vector<2x32x512xf32>
      %40 = arith.mulf %39, %38 : vector<2x32x512xf32>
      %cst_28 = arith.constant dense<0.000000e+00> : vector<2x512xf32>
      %41 = vector.multi_reduction <add>, %40, %cst_28 [1] : vector<2x32x512xf32> to vector<2x512xf32>
      %42 = arith.truncf %41 : vector<2x512xf32> to vector<2x512xbf16>
      %c0_29 = arith.constant 0 : index
      %c0_30 = arith.constant 0 : index
      %43 = vector.load %arg8[%c0_29, %c0_30] : memref<512x512xbf16, #tpu.memory_space<vmem>>, vector<512x512xbf16>
      %cst_31 = arith.constant dense<0.000000e+00> : vector<2x512xf32>
      %44 = tpu.matmul %42, %43, %cst_31 {dimension_numbers = #tpu.dot_dimension_numbers<[1], [0], [0], [1], [0, 0, 1, 1], [], []>} : vector<2x512xbf16>, vector<512x512xbf16>, vector<2x512xf32> -> vector<2x512xf32>
      %c0_32 = arith.constant 0 : index
      %c0_33 = arith.constant 0 : index
      %45 = vector.load %arg9[%c0_32, %c0_33] : memref<128x512xbf16, #tpu.memory_space<vmem>>, vector<128x512xbf16>
      %cst_34 = arith.constant dense<0.000000e+00> : vector<2x512xf32>
      %46 = tpu.matmul %11, %45, %cst_34 {dimension_numbers = #tpu.dot_dimension_numbers<[1], [0], [0], [1], [0, 0, 1, 1], [], []>} : vector<2x128xbf16>, vector<128x512xbf16>, vector<2x512xf32> -> vector<2x512xf32>
      %47 = arith.addf %44, %46 : vector<2x512xf32>
      %c0_35 = arith.constant 0 : index
      %48 = arith.index_cast %arg14 : i32 to index
      %c0_36 = arith.constant 0 : index
      %c0_37 = arith.constant 0 : index
      %49 = vector.load %arg4[%c0_35, %48, %c0_36, %c0_37] : memref<1x5x2x512xbf16, #tpu.memory_space<vmem>>, vector<1x1x2x512xbf16>
      %50 = vector.shape_cast %49 : vector<1x1x2x512xbf16> to vector<2x512xbf16>
      %51 = arith.extf %50 : vector<2x512xbf16> to vector<2x512xf32>
      %52 = arith.addf %47, %51 : vector<2x512xf32>
      %53 = vector.broadcast %1 : vector<1x512xf32> to vector<2x512xf32>
      %54 = arith.addf %52, %53 : vector<2x512xf32>
      %55 = vector.extract_strided_slice %54 {offsets = [0, 0], sizes = [2, 128], strides = [1, 1]} : vector<2x512xf32> to vector<2x128xf32>
      %56 = arith.negf %55 : vector<2x128xf32>
      %57 = math.exp %56 : vector<2x128xf32>
      %cst_38 = arith.constant 1.000000e+00 : f32
      %58 = vector.broadcast %cst_38 : f32 to vector<2x128xf32>
      %59 = arith.addf %58, %57 : vector<2x128xf32>
      %60 = arith.divf %58, %59 : vector<2x128xf32>
      %61 = vector.extract_strided_slice %54 {offsets = [0, 128], sizes = [2, 128], strides = [1, 1]} : vector<2x512xf32> to vector<2x128xf32>
      %62 = arith.negf %61 : vector<2x128xf32>
      %63 = math.exp %62 : vector<2x128xf32>
      %cst_39 = arith.constant 1.000000e+00 : f32
      %64 = vector.broadcast %cst_39 : f32 to vector<2x128xf32>
      %65 = arith.addf %64, %63 : vector<2x128xf32>
      %66 = arith.divf %64, %65 : vector<2x128xf32>
      %67 = vector.extract_strided_slice %54 {offsets = [0, 256], sizes = [2, 128], strides = [1, 1]} : vector<2x512xf32> to vector<2x128xf32>
      %68 = math.tanh %67 : vector<2x128xf32>
      %69 = vector.extract_strided_slice %54 {offsets = [0, 384], sizes = [2, 128], strides = [1, 1]} : vector<2x512xf32> to vector<2x128xf32>
      %70 = arith.negf %69 : vector<2x128xf32>
      %71 = math.exp %70 : vector<2x128xf32>
      %cst_40 = arith.constant 1.000000e+00 : f32
      %72 = vector.broadcast %cst_40 : f32 to vector<2x128xf32>
      %73 = arith.addf %72, %71 : vector<2x128xf32>
      %74 = arith.divf %72, %73 : vector<2x128xf32>
      %75 = arith.mulf %66, %10 : vector<2x128xf32>
      %76 = arith.mulf %60, %68 : vector<2x128xf32>
      %77 = arith.addf %75, %76 : vector<2x128xf32>
      %78 = math.tanh %77 : vector<2x128xf32>
      %79 = arith.mulf %74, %78 : vector<2x128xf32>
      %c0_41 = arith.constant 0 : index
      %c0_42 = arith.constant 0 : index
      %80 = vector.load %arg12[%c0_41, %c0_42] : memref<2x128xf32, #tpu.memory_space<vmem>>, vector<2x128xf32>
      tpu.vector_store %arg12[%c0_41, %c0_42], %79 {strides = array<i32>} : memref<2x128xf32, #tpu.memory_space<vmem>>, vector<2x128xf32>,
      %c0_43 = arith.constant 0 : index
      %c0_44 = arith.constant 0 : index
      %81 = vector.load %arg13[%c0_43, %c0_44] : memref<2x128xf32, #tpu.memory_space<vmem>>, vector<2x128xf32>
      tpu.vector_store %arg13[%c0_43, %c0_44], %77 {strides = array<i32>} : memref<2x128xf32, #tpu.memory_space<vmem>>, vector<2x128xf32>,
      %82 = arith.truncf %79 : vector<2x128xf32> to vector<2x128xbf16>
      %c0_45 = arith.constant 0 : index
      %83 = arith.index_cast %arg14 : i32 to index
      %c0_46 = arith.constant 0 : index
      %c0_47 = arith.constant 0 : index
      %84 = vector.load %arg11[%c0_45, %83, %c0_46, %c0_47] : memref<1x5x2x128xbf16, #tpu.memory_space<vmem>>, vector<1x1x2x128xbf16>
      %85 = vector.shape_cast %84 : vector<1x1x2x128xbf16> to vector<2x128xbf16>
      %86 = vector.shape_cast %82 : vector<2x128xbf16> to vector<1x1x2x128xbf16>
      tpu.vector_store %arg11[%c0_45, %83, %c0_46, %c0_47], %86 {strides = array<i32>} : memref<1x5x2x128xbf16, #tpu.memory_space<vmem>>, vector<1x1x2x128xbf16>,
    }
    %c5_i32_10 = arith.constant 5 : i32
    return
  }
  func.func @transform_0(%arg0: i32, %arg1: i32) -> (i32, i32, i32) {
    %c0_i32 = arith.constant 0 : i32
    %c0_i32_0 = arith.constant 0 : i32
    %c0_i32_1 = arith.constant 0 : i32
    return %arg0, %c0_i32, %c0_i32_0 : i32, i32, i32
  }
  func.func @transform_1(%arg0: i32, %arg1: i32) -> (i32, i32, i32) {
    %c0_i32 = arith.constant 0 : i32
    %c0_i32_0 = arith.constant 0 : i32
    %c0_i32_1 = arith.constant 0 : i32
    return %arg0, %c0_i32, %c0_i32_0 : i32, i32, i32
  }
  func.func @transform_2(%arg0: i32, %arg1: i32) -> (i32, i32, i32, i32) {
    %c0_i32 = arith.constant 0 : i32
    %c0_i32_0 = arith.constant 0 : i32
    %c0_i32_1 = arith.constant 0 : i32
    return %arg1, %c0_i32, %arg0, %c0_i32_0 : i32, i32, i32, i32
  }
  func.func @transform_3(%arg0: i32, %arg1: i32) -> (i32, i32) {
    %c0_i32 = arith.constant 0 : i32
    %c0_i32_0 = arith.constant 0 : i32
    %c0_i32_1 = arith.constant 0 : i32
    return %c0_i32, %c0_i32_0 : i32, i32
  }
  func.func @transform_4(%arg0: i32, %arg1: i32) -> (i32, i32) {
    %c0_i32 = arith.constant 0 : i32
    %c0_i32_0 = arith.constant 0 : i32
    %c0_i32_1 = arith.constant 0 : i32
    return %c0_i32, %c0_i32_0 : i32, i32
  }
  func.func @transform_5(%arg0: i32, %arg1: i32) -> (i32, i32) {
    %c0_i32 = arith.constant 0 : i32
    %c0_i32_0 = arith.constant 0 : i32
    %c0_i32_1 = arith.constant 0 : i32
    return %c0_i32, %c0_i32_0 : i32, i32
  }
  func.func @transform_6(%arg0: i32, %arg1: i32) -> (i32, i32) {
    %c0_i32 = arith.constant 0 : i32
    %c0_i32_0 = arith.constant 0 : i32
    %c0_i32_1 = arith.constant 0 : i32
    return %c0_i32, %c0_i32_0 : i32, i32
  }
  func.func @transform_7(%arg0: i32, %arg1: i32) -> (i32, i32) {
    %c0_i32 = arith.constant 0 : i32
    %c0_i32_0 = arith.constant 0 : i32
    %c0_i32_1 = arith.constant 0 : i32
    return %c0_i32, %c0_i32_0 : i32, i32
  }
  func.func @transform_8(%arg0: i32, %arg1: i32) -> (i32, i32) {
    %c0_i32 = arith.constant 0 : i32
    %c0_i32_0 = arith.constant 0 : i32
    %c0_i32_1 = arith.constant 0 : i32
    return %c0_i32, %c0_i32_0 : i32, i32
  }
  func.func @transform_9(%arg0: i32, %arg1: i32) -> (i32, i32, i32, i32) {
    %c0_i32 = arith.constant 0 : i32
    %c0_i32_0 = arith.constant 0 : i32
    %c0_i32_1 = arith.constant 0 : i32
    return %arg1, %c0_i32, %arg0, %c0_i32_0 : i32, i32, i32, i32
  }
}

module attributes {stable_mosaic.version = 11 : i64} {
  func.func @_matmul_bias_kernel(%arg0: i32, %arg1: i32, %arg2: memref<8x128xbf16, #tpu.memory_space<vmem>>, %arg3: memref<128x128xbf16, #tpu.memory_space<vmem>>, %arg4: memref<1x128xf32, #tpu.memory_space<vmem>>, %arg5: memref<8x128xf32, #tpu.memory_space<vmem>>) attributes {dimension_semantics = [#tpu.dimension_semantics<parallel>, #tpu.dimension_semantics<parallel>], iteration_bounds = array<i64: 3, 1>, scalar_prefetch = 0 : i64, scratch_operands = 0 : i64, tpu.core_type = #tpu.core_type<tc>, window_params = [{transform_indices = @transform_0, window_bounds = array<i64: 8, 128>}, {transform_indices = @transform_1, window_bounds = array<i64: 128, 128>}, {transform_indices = @transform_2, window_bounds = array<i64: 1, 128>}, {transform_indices = @transform_3, window_bounds = array<i64: 8, 128>}]} {
    %c0 = arith.constant 0 : index
    %c0_0 = arith.constant 0 : index
    %0 = vector.load %arg2[%c0, %c0_0] : memref<8x128xbf16, #tpu.memory_space<vmem>>, vector<8x128xbf16>
    %c0_1 = arith.constant 0 : index
    %c0_2 = arith.constant 0 : index
    %1 = vector.load %arg3[%c0_1, %c0_2] : memref<128x128xbf16, #tpu.memory_space<vmem>>, vector<128x128xbf16>
    %cst = arith.constant dense<0.000000e+00> : vector<8x128xf32>
    %2 = tpu.matmul %0, %1, %cst {dimension_numbers = #tpu.dot_dimension_numbers<[1], [0], [0], [1], [0, 0, 1, 1], [], []>} : vector<8x128xbf16>, vector<128x128xbf16>, vector<8x128xf32> -> vector<8x128xf32>
    %c0_3 = arith.constant 0 : index
    %c0_4 = arith.constant 0 : index
    %3 = vector.load %arg4[%c0_3, %c0_4] : memref<1x128xf32, #tpu.memory_space<vmem>>, vector<1x128xf32>
    %4 = vector.broadcast %3 : vector<1x128xf32> to vector<8x128xf32>
    %5 = arith.addf %2, %4 : vector<8x128xf32>
    %c0_5 = arith.constant 0 : index
    %c0_6 = arith.constant 0 : index
    %6 = vector.load %arg5[%c0_5, %c0_6] : memref<8x128xf32, #tpu.memory_space<vmem>>, vector<8x128xf32>
    tpu.vector_store %arg5[%c0_5, %c0_6], %5 {strides = array<i32>} : memref<8x128xf32, #tpu.memory_space<vmem>>, vector<8x128xf32>,
    return
  }
  func.func @transform_0(%arg0: i32, %arg1: i32) -> (i32, i32) {
    %c0_i32 = arith.constant 0 : i32
    %c0_i32_0 = arith.constant 0 : i32
    return %arg0, %c0_i32 : i32, i32
  }
  func.func @transform_1(%arg0: i32, %arg1: i32) -> (i32, i32) {
    %c0_i32 = arith.constant 0 : i32
    %c0_i32_0 = arith.constant 0 : i32
    return %c0_i32, %arg1 : i32, i32
  }
  func.func @transform_2(%arg0: i32, %arg1: i32) -> (i32, i32) {
    %c0_i32 = arith.constant 0 : i32
    %c0_i32_0 = arith.constant 0 : i32
    return %c0_i32, %arg1 : i32, i32
  }
  func.func @transform_3(%arg0: i32, %arg1: i32) -> (i32, i32) {
    %c0_i32 = arith.constant 0 : i32
    return %arg0, %arg1 : i32, i32
  }
}

module attributes {stable_mosaic.version = 11 : i64} {
  func.func @_ce_kernel(%arg0: i32, %arg1: memref<8x128xf32, #tpu.memory_space<vmem>>, %arg2: memref<8x1xi32, #tpu.memory_space<vmem>>, %arg3: memref<8x1xf32, #tpu.memory_space<vmem>>) attributes {dimension_semantics = [#tpu.dimension_semantics<parallel>], iteration_bounds = array<i64: 3>, scalar_prefetch = 0 : i64, scratch_operands = 0 : i64, tpu.core_type = #tpu.core_type<tc>, window_params = [{transform_indices = @transform_0, window_bounds = array<i64: 8, 128>}, {transform_indices = @transform_1, window_bounds = array<i64: 8, 1>}, {transform_indices = @transform_2, window_bounds = array<i64: 8, 1>}]} {
    %c0 = arith.constant 0 : index
    %c0_0 = arith.constant 0 : index
    %0 = vector.load %arg1[%c0, %c0_0] : memref<8x128xf32, #tpu.memory_space<vmem>>, vector<8x128xf32>
    %c0_1 = arith.constant 0 : index
    %c0_2 = arith.constant 0 : index
    %1 = vector.load %arg2[%c0_1, %c0_2] : memref<8x1xi32, #tpu.memory_space<vmem>>, vector<8x1xi32>
    %2 = tpu.iota {dimensions = array<i32: 1>} : vector<8x128xi32>
    %c16_i32 = arith.constant 16 : i32
    %3 = vector.broadcast %c16_i32 : i32 to vector<8x128xi32>
    %4 = arith.cmpi slt, %2, %3 : vector<8x128xi32>
    %cst = arith.constant -1.000000e+30 : f32
    %5 = vector.broadcast %cst : f32 to vector<8x128xf32>
    %6 = arith.select %4, %0, %5 : vector<8x128xi1>, vector<8x128xf32>
    %cst_3 = arith.constant dense<0xFF800000> : vector<8xf32>
    %7 = vector.multi_reduction <maximumf>, %6, %cst_3 [1] : vector<8x128xf32> to vector<8xf32>
    %8 = vector.shape_cast %7 : vector<8xf32> to vector<8x1xf32>
    %9 = vector.broadcast %8 : vector<8x1xf32> to vector<8x128xf32>
    %10 = arith.subf %6, %9 : vector<8x128xf32>
    %11 = math.exp %10 : vector<8x128xf32>
    %cst_4 = arith.constant dense<0.000000e+00> : vector<8xf32>
    %12 = vector.multi_reduction <add>, %11, %cst_4 [1] : vector<8x128xf32> to vector<8xf32>
    %13 = vector.shape_cast %12 : vector<8xf32> to vector<8x1xf32>
    %14 = math.log %13 : vector<8x1xf32>
    %15 = arith.addf %14, %8 : vector<8x1xf32>
    %16 = vector.broadcast %1 : vector<8x1xi32> to vector<8x128xi32>
    %17 = arith.cmpi eq, %2, %16 : vector<8x128xi32>
    %cst_5 = arith.constant 0.000000e+00 : f32
    %18 = vector.broadcast %cst_5 : f32 to vector<8x128xf32>
    %19 = arith.select %17, %6, %18 : vector<8x128xi1>, vector<8x128xf32>
    %cst_6 = arith.constant dense<0.000000e+00> : vector<8xf32>
    %20 = vector.multi_reduction <add>, %19, %cst_6 [1] : vector<8x128xf32> to vector<8xf32>
    %21 = vector.shape_cast %20 : vector<8xf32> to vector<8x1xf32>
    %22 = arith.subf %15, %21 : vector<8x1xf32>
    %c0_i32 = arith.constant 0 : i32
    %23 = vector.broadcast %c0_i32 : i32 to vector<8x1xi32>
    %24 = arith.cmpi ne, %1, %23 : vector<8x1xi32>
    %cst_7 = arith.constant 0.000000e+00 : f32
    %25 = vector.broadcast %cst_7 : f32 to vector<8x1xf32>
    %26 = arith.select %24, %22, %25 : vector<8x1xi1>, vector<8x1xf32>
    %c0_8 = arith.constant 0 : index
    %c0_9 = arith.constant 0 : index
    %27 = vector.load %arg3[%c0_8, %c0_9] : memref<8x1xf32, #tpu.memory_space<vmem>>, vector<8x1xf32>
    tpu.vector_store %arg3[%c0_8, %c0_9], %26 {strides = array<i32>} : memref<8x1xf32, #tpu.memory_space<vmem>>, vector<8x1xf32>,
    return
  }
  func.func @transform_0(%arg0: i32) -> (i32, i32) {
    %c0_i32 = arith.constant 0 : i32
    %c0_i32_0 = arith.constant 0 : i32
    return %arg0, %c0_i32 : i32, i32
  }
  func.func @transform_1(%arg0: i32) -> (i32, i32) {
    %c0_i32 = arith.constant 0 : i32
    %c0_i32_0 = arith.constant 0 : i32
    return %arg0, %c0_i32 : i32, i32
  }
  func.func @transform_2(%arg0: i32) -> (i32, i32) {
    %c0_i32 = arith.constant 0 : i32
    %c0_i32_0 = arith.constant 0 : i32
    return %arg0, %c0_i32 : i32, i32
  }
}

</mosaic_0001>

<bundles_post_ra>
// kernel: attn_model_forward.5
= control target key start
LH: loop header
LB: loop body
LE: loop exit
PB: predicated region body
PF: predicated region fallthrough
CT: control target
= control target key end

     0   :  { %s823_s12 = smov 0   ;;  %s825_s13 = smov 0   ;;  %s933_s0 = inlined_call_operand.vmem [shape: bf16[64,32], index: 0, kind: input, shape index: {}]   ;;  %s934_s1 = inlined_call_operand.vmem [shape: bf16[32,512], index: 1, kind: input, shape index: {}]   ;;  %s935_s2 = inlined_call_operand.vmem [shape: f32[1,512], index: 2, kind: input, shape index: {}]   ;;  %s936_s3 = inlined_call_operand.vmem [shape: bf16[64,512], index: 3, kind: output, shape index: {}]  }
   0x1   :  { %s827_s14 = smov 0   ;;  %s829_s15 = smov 0  }
   0x2   :  { %s831_s16 = smov 0  }
   0x3 LB: > { %s22_s17 = sadd.s32 1, %s796_s15  ;;  %s660_s18 = sadd.s32 4294967295, %s800_s16   ;;  %s800_s16 = sphi %s831_s16, %s13_s16   ;;  %s796_s15 = sphi %s829_s15, %s941_s15   ;;  %s792_s14 = sphi %s827_s14, %s940_s14   ;;  %s788_s13 = sphi %s825_s13, %s939_s13   ;;  %s784_s12 = sphi %s823_s12, %s938_s12  }
   0x4   : > { %p23_p0 = scmp.ge.s32.totalorder %s22_s17, 2  ;;  %p65_p1 = scmp.ne.s32.totalorder %s788_s13, %s784_s12 }
   0x5   : > { %p66_p2 = scmp.eq.s32.totalorder %s800_s16, 0  ;;  %p123_p4 = scmp.eq.s32.totalorder %s660_s18, 1 }
   0x6   : > { %s943_s17 = smov (%p23_p0, %s22_s17), 0  ;;  %s58_s20 = sadd.s32 1, %s788_s13 }
   0x7   : > { %p67_p3 = por %p66_p2, %p65_p1  ;;  %s55_s19 = ssub.s32 %s796_s15, %s943_s17 }
   0x8   : > { %p56_p5 = scmp.eq.s32.totalorder %s55_s19, 0  ;;  %p858_p6 = por %p123_p4, %p65_p1 }
   0x9   : > { %p664_p7 = scmp.ge.s32.totalorder %s800_s16, 2 }
   0xa   : > { %s863_s22 = scalar_select %p56_p5, %s788_s13, %s58_s20  }
   0xb   : > { %154 = sbr.rel (%p664_p7) target bundleno = 22 (0x16), region = 20 }
  0x10   : > { %157 = sbr.rel (!%p67_p3) target bundleno = 22 (0x16), region = 24  ;;  %s159_s23 = sand.u32 (%p67_p3), 1, %s788_s13  }
  0x11   : > { %s697_s24 = sshll.u32 (%p67_p3), %s796_s15, 3  ;;  %s665_s25 = sshll.u32 (%p67_p3), %s159_s23, 5 }
  0x12   : > { %s164_s28 = scalar_lea.vmem (%p67_p3), %s934_s1, %s697_s24  ;;  %s161_s29 = scalar_lea.vmem (%p67_p3), [#allocation2], %s665_s25 }
  0x13   : > { %v199_v0 = vld [vmem:[%s164_s28] sm:$0xff] (%p67_p3)  ;;  %v201_v1 = vld [vmem:[%s164_s28 + $0x10] sm:$0xff] (%p67_p3) }
  0x14   : > { %v203_v2 = vld [vmem:[%s164_s28 + $0x20] sm:$0xff] (%p67_p3)  ;;  %200 = vst [vmem:[%s161_s29] sm:$0xff] (%p67_p3), %v199_v0  ;;  %202 = vst [vmem:[%s161_s29 + $0x8] sm:$0xff] (%p67_p3), %v201_v1  ;;  %v205_v3 = vld [vmem:[%s164_s28 + $0x30] sm:$0xff] (%p67_p3) }
  0x15   : > { %204 = vst [vmem:[%s161_s29 + $0x10] sm:$0xff] %v203_v2  ;;  %206 = vst [vmem:[%s161_s29 + $0x18] sm:$0xff] %v205_v3 }
  0x16 PF: > { %p668_p8 = scmp.ge.s32.totalorder %s800_s16, 1  ;;  %p219_p9 = scmp.lt.s32.totalorder %s800_s16, 3 }
  0x18   : > { %p220_p10 = pnand %p668_p8, %p219_p9 }
  0x19   : > { %s226_s30 = sand.u32 (!%p220_p10), 1, %s784_s12   ;;  %s671_s20 = sshll.u32 (!%p220_p10), %s792_s14, 1 }
  0x1a   : > { %223 = sbr.rel (%p220_p10) target bundleno = 264 (0x108), region = 66  ;;  %s669_s4 = sshll.u32 (!%p220_p10), %s226_s30, 5 }
  0x1b   : > { %s228_s5 = scalar_lea.vmem (!%p220_p10), [#allocation2], %s669_s4  ;;  %p265_p11 = scmp.lt.s32.totalorder (!%p220_p10), %s671_s20, 3 }
  0x1c   : > { %s670_s26 = sshll.u32 (!%p220_p10), %s226_s30, 6 }
  0x1d   : > { %s894_s12 = scalar_lea.vmem (!%p220_p10), [#allocation3], %s670_s26 }
  0x1f   : > { %v802_v4 = vmov 0   ;;  %v752_v5 = vld [vmem:[%s228_s5 + $0x14] ss:$8 sps:$4 sm:$0xff]   ;;  %v754_v6 = vld [vmem:[%s228_s5 + $0x10] ss:$8 sps:$4 sm:$0xff]   ;;  %v758_v9 = vld [vmem:[%s933_s0] sm:$0xff]   ;;  %v286_v13 = vlaneseq }
  0x20   : > { %381 = vmatprep.mubr.bf16.mxu0 %v802_v4  ;;  %401 = vmatprep.mubr.bf16.mxu1 %v802_v4  ;;  %v755_v7 = vld [vmem:[%s228_s5 + $0x4] ss:$8 sps:$4 sm:$0xff]   ;;  %v757_v8 = vld [vmem:[%s228_s5] ss:$8 sps:$4 sm:$0xff]   ;;  %v759_v10 = vld [vmem:[%s933_s0 + $0x10] sm:$0xff]   ;;  %vm336_vm0 = vcmask 261120  }
  0x21   : > { %361 = vmatprep.subr.bf16.mxu0 %v752_v5  ;;  %707 = vmatprep.subr.bf16.mxu1 %v752_v5  ;;  %v760_v11 = vld [vmem:[%s933_s0 + $0x8] sm:$0xff]   ;;  %v761_v12 = vld [vmem:[%s933_s0 + $0x18] sm:$0xff]   ;;  %s945_s20 = smov (!%p265_p11, %s671_s20), 3  ;;  %v287_v14 = vshrl.u32 %v286_v13, 7  ;;  %s706_s27 = sshll.u32 (%p858_p6), %s792_s14, 3 }
  0x22   : > { %362 = vmatpush1.bf16.msra.mxu0 %v754_v6  ;;  %709 = vmatpush1.bf16.msra.mxu1 %v754_v6  ;;  %s267_s25 = scalar_lea.vmem %s935_s2, %s945_s20  ;;  %s506_s30 = scalar_lea.vmem (%p858_p6), %s936_s3, %s706_s27 }
  0x23   : > { %363 = vmatprep.subr.bf16.mxu0 %v755_v7  ;;  %708 = vmatprep.subr.bf16.mxu1 %v755_v7  ;;  %v288_v15 = vsub.s32 0, %v287_v14  ;;  %v284_v16 = vld [vmem:[%s267_s25] sm:$0x3]  ;;  %v292_v17 = vsub.s32 1, %v287_v14 }
  0x25   : > { %v289_v18 = vrot.slane %v284_v16, %v288_v15  ;;  %v293_v19 = vrot.slane %v284_v16, %v292_v17 }
  0x26   : > { %364 = vmatpush1.bf16.msra.mxu0 %v757_v8  ;;  %710 = vmatpush1.bf16.msra.mxu1 %v757_v8 }
  0x29   : > { %680 = vmatmul.mubr.msk.bf16.vlgmr.msra.gmra.mxu0 %vm336_vm0, %v758_v9  ;;  %682 = vmatmul.mubr.msk.bf16.vlgmr.msra.gmra.mxu1 %vm336_vm0, %v759_v10 }
  0x2a   : > { %391 = vmatprep.mubr.bf16.mxu0 %v802_v4  ;;  %411 = vmatprep.mubr.bf16.mxu1 %v802_v4 }
  0x31   : > { %681 = vmatmul.mubr.msk.bf16.gmra.mxu0 %vm336_vm0, %v760_v11  ;;  %683 = vmatmul.mubr.msk.bf16.gmra.mxu1 %vm336_vm0, %v761_v12 }
  0xe9   : > { %v383_v20 = vpop.f32.mrf.mxu0  ;;  %v403_v21 = vpop.f32.mrf.mxu1 }
  0xea   : > { %v384_v22 = vadd.f32 %v383_v20, %v289_v18  ;;  %v404_v23 = vadd.f32 %v403_v21, %v289_v18 }
  0xeb   : > { %v385_v24 = vpop.f32.mrf.mxu0  ;;  %v405_v25 = vpop.f32.mrf.mxu1 }
  0xec   : > { %v386_v26 = vadd.f32 %v385_v24, %v293_v19  ;;  %v406_v27 = vadd.f32 %v405_v25, %v293_v19  ;;  %v422_v30 = vmax.f32 %v384_v22, 0.0  ;;  %v430_v31 = vmax.f32 %v404_v23, 0.0 }
  0xed   : > { %v387_v28 = vpop.f32.mrf.mxu0  ;;  %v407_v29 = vpop.f32.mrf.mxu1 }
  0xee   : > { %v423_v32 = vmax.f32 %v386_v26, 0.0  ;;  %v431_v33 = vmax.f32 %v406_v27, 0.0  ;;  %v388_v34 = vadd.f32 %v387_v28, %v289_v18  ;;  %v408_v35 = vadd.f32 %v407_v29, %v289_v18 }
  0xef   : > { %v389_v36 = vpop.f32.mrf.mxu0  ;;  %v409_v37 = vpop.f32.mrf.mxu1 }
  0xf0   : > { %v698_v38 = vpack.c.bf16 %v423_v32, %v422_v30  ;;  %v702_v39 = vpack.c.bf16 %v431_v33, %v430_v31  ;;  %v390_v40 = vadd.f32 %v389_v36, %v293_v19  ;;  %v410_v41 = vadd.f32 %v409_v37, %v293_v19 }
  0xf1   : > { %v393_v42 = vpop.f32.mrf.mxu0  ;;  %v413_v43 = vpop.f32.mrf.mxu1  ;;  %v424_v46 = vmax.f32 %v388_v34, 0.0  ;;  %v432_v47 = vmax.f32 %v408_v35, 0.0 }
  0xf2   : > { %486 = vst [vmem:[%s894_s12] sm:$0xff] %v698_v38  ;;  %490 = vst [vmem:[%s894_s12 + $0x20] sm:$0xff] %v702_v39  ;;  %v394_v44 = vadd.f32 %v393_v42, %v289_v18  ;;  %v414_v45 = vadd.f32 %v413_v43, %v289_v18  ;;  %v425_v48 = vmax.f32 %v390_v40, 0.0  ;;  %v433_v49 = vmax.f32 %v410_v41, 0.0 }
  0xf3   : > { %v395_v50 = vpop.f32.mrf.mxu0  ;;  %v415_v51 = vpop.f32.mrf.mxu1 }
  0xf4   : > { %v396_v52 = vadd.f32 %v395_v50, %v293_v19  ;;  %v416_v53 = vadd.f32 %v415_v51, %v293_v19  ;;  %v699_v54 = vpack.c.bf16 %v425_v48, %v424_v46  ;;  %v703_v55 = vpack.c.bf16 %v433_v49, %v432_v47 }
  0xf5   : > { %v397_v56 = vpop.f32.mrf.mxu0  ;;  %v417_v57 = vpop.f32.mrf.mxu1  ;;  %v426_v58 = vmax.f32 %v394_v44, 0.0  ;;  %v434_v59 = vmax.f32 %v414_v45, 0.0 }
  0xf6   : > { %v427_v60 = vmax.f32 %v396_v52, 0.0  ;;  %v435_v61 = vmax.f32 %v416_v53, 0.0  ;;  %487 = vst [vmem:[%s894_s12 + $0x8] sm:$0xff] %v699_v54  ;;  %491 = vst [vmem:[%s894_s12 + $0x28] sm:$0xff] %v703_v55  ;;  %v398_v62 = vadd.f32 %v397_v56, %v289_v18  ;;  %v418_v63 = vadd.f32 %v417_v57, %v289_v18 }
  0xf7   : > { %v399_v0 = vpop.f32.mrf.mxu0  ;;  %v419_v1 = vpop.f32.mrf.mxu1 }
  0xf8   : > { %v700_v2 = vpack.c.bf16 %v427_v60, %v426_v58  ;;  %v704_v3 = vpack.c.bf16 %v435_v61, %v434_v59  ;;  %v400_v4 = vadd.f32 %v399_v0, %v293_v19  ;;  %v420_v5 = vadd.f32 %v419_v1, %v293_v19 }
  0xf9   : > { %v428_v6 = vmax.f32 %v398_v62, 0.0  ;;  %v436_v7 = vmax.f32 %v418_v63, 0.0  ;;  %v549_v12 = vld [vmem:[%s894_s12] sm:$0xff] (%p858_p6) }
  0xfa   : > { %488 = vst [vmem:[%s894_s12 + $0x10] sm:$0xff] %v700_v2  ;;  %492 = vst [vmem:[%s894_s12 + $0x30] sm:$0xff] %v704_v3  ;;  %v429_v8 = vmax.f32 %v400_v4, 0.0  ;;  %v437_v9 = vmax.f32 %v420_v5, 0.0  ;;  %500 = sbr.rel (!%p858_p6) target bundleno = 264 (0x108), region = 74  ;;  %v557_v16 = vld [vmem:[%s894_s12 + $0x20] sm:$0xff] (%p858_p6) }
  0xfb   : > { %550 = vst [vmem:[%s506_s30] sm:$0xff] (%p858_p6), %v549_v12  ;;  %558 = vst [vmem:[%s506_s30 + $0x40] sm:$0xff] (%p858_p6), %v557_v16 }
  0xfc   : > { %v701_v10 = vpack.c.bf16 %v429_v8, %v428_v6  ;;  %v705_v11 = vpack.c.bf16 %v437_v9, %v436_v7 }
  0xfd   : > { %v551_v13 = vld [vmem:[%s894_s12 + $0x8] sm:$0xff] (%p858_p6) }
  0xfe   : > { %489 = vst [vmem:[%s894_s12 + $0x18] sm:$0xff] %v701_v10  ;;  %493 = vst [vmem:[%s894_s12 + $0x38] sm:$0xff] %v705_v11  ;;  %v559_v17 = vld [vmem:[%s894_s12 + $0x28] sm:$0xff] (%p858_p6) }
  0xff   : > { %552 = vst [vmem:[%s506_s30 + $0x10] sm:$0xff] %v551_v13  ;;  %560 = vst [vmem:[%s506_s30 + $0x50] sm:$0xff] %v559_v17 }
 0x101   : > { %v553_v14 = vld [vmem:[%s894_s12 + $0x10] sm:$0xff] }
 0x102   : > { %554 = vst [vmem:[%s506_s30 + $0x20] sm:$0xff] %v553_v14  ;;  %v561_v18 = vld [vmem:[%s894_s12 + $0x30] sm:$0xff] }
 0x103   : > { %562 = vst [vmem:[%s506_s30 + $0x60] sm:$0xff] %v561_v18 }
 0x105   : > { %v555_v15 = vld [vmem:[%s894_s12 + $0x18] sm:$0xff] }
 0x106   : > { %556 = vst [vmem:[%s506_s30 + $0x30] sm:$0xff] %v555_v15  ;;  %v563_v19 = vld [vmem:[%s894_s12 + $0x38] sm:$0xff] }
 0x107   : > { %564 = vst [vmem:[%s506_s30 + $0x70] sm:$0xff] %v563_v19 }
 0x108 PF: > { %s13_s16 = sadd.s32 1, %s800_s16   ;;  %s938_s12 = smov %s788_s13 }
 0x109   : > { %p10_p12 = scmp.ge.s32.totalorder %s13_s16, 4   ;;  %s939_s13 = smov %s863_s22 }
 0x10a   : > { %s940_s14 = smov %s796_s15  ;;  %s941_s15 = smov %s943_s17 }
 0x10b   :  { %12 = sbr.rel (!%p10_p12) target bundleno = 3 (0x3), region = 149 }

// kernel: attn_model_forward.6
= control target key start
LH: loop header
LB: loop body
LE: loop exit
PB: predicated region body
PF: predicated region fallthrough
CT: control target
= control target key end

     0   :  { %s961_s1 = inlined_call_operand.vmem [shape: bf16[512,128], index: 1, kind: input, shape index: {}]   ;;  %s962_s0 = inlined_call_operand.vmem [shape: bf16[64,512], index: 0, kind: input, shape index: {}]   ;;  %s963_s2 = inlined_call_operand.vmem [shape: f32[1,128], index: 2, kind: input, shape index: {}]   ;;  %s964_s3 = inlined_call_operand.vmem [shape: bf16[64,128], index: 3, kind: output, shape index: {}]  }
   0x1   :  { %v716_v0 = vld [vmem:[%s961_s1 + $0x78] sm:$0xff]   ;;  %v720_v4 = vld [vmem:[%s961_s1 + $0x70] sm:$0xff]   ;;  %v724_v8 = vld [vmem:[%s961_s1 + $0x68] sm:$0xff]  }
   0x2   :  { %v717_v1 = vld [vmem:[%s961_s1 + $0xf8] sm:$0xff]   ;;  %636 = vmatprep.subr.bf16.mxu0 %v716_v0  ;;  %v721_v5 = vld [vmem:[%s961_s1 + $0xf0] sm:$0xff]   ;;  %v725_v9 = vld [vmem:[%s961_s1 + $0xe8] sm:$0xff]  }
   0x3   :  { %v718_v2 = vld [vmem:[%s961_s1 + $0x38] sm:$0xff]   ;;  %676 = vmatprep.subr.bf16.mxu1 %v717_v1  ;;  %v722_v6 = vld [vmem:[%s961_s1 + $0x30] sm:$0xff]   ;;  %v726_v10 = vld [vmem:[%s961_s1 + $0x28] sm:$0xff]  }
   0x4   :  { %v719_v3 = vld [vmem:[%s961_s1 + $0xb8] sm:$0xff]   ;;  %637 = vmatpush3.bf16.msra.mxu0 %v718_v2  ;;  %v723_v7 = vld [vmem:[%s961_s1 + $0xb0] sm:$0xff]   ;;  %v727_v11 = vld [vmem:[%s961_s1 + $0xa8] sm:$0xff]  }
   0x5   :  { %677 = vmatpush3.bf16.msra.mxu1 %v719_v3  ;;  %638 = vmatprep.subr.bf16.mxu0 %v720_v4  ;;  %v728_v12 = vld [vmem:[%s961_s1 + $0x60] sm:$0xff]   ;;  %v732_v16 = vld [vmem:[%s961_s1 + $0x58] sm:$0xff]   ;;  %v736_v20 = vld [vmem:[%s961_s1 + $0x50] sm:$0xff]  }
   0x6   :  { %678 = vmatprep.subr.bf16.mxu1 %v721_v5  ;;  %v729_v13 = vld [vmem:[%s961_s1 + $0xe0] sm:$0xff]   ;;  %v733_v17 = vld [vmem:[%s961_s1 + $0xd8] sm:$0xff]   ;;  %v737_v21 = vld [vmem:[%s961_s1 + $0xd0] sm:$0xff]  }
   0x7   :  { %v730_v14 = vld [vmem:[%s961_s1 + $0x20] sm:$0xff]   ;;  %v734_v18 = vld [vmem:[%s961_s1 + $0x18] sm:$0xff]   ;;  %v738_v22 = vld [vmem:[%s961_s1 + $0x10] sm:$0xff]  }
   0x8   :  { %639 = vmatpush3.bf16.msra.mxu0 %v722_v6  ;;  %v731_v15 = vld [vmem:[%s961_s1 + $0xa0] sm:$0xff]   ;;  %v735_v19 = vld [vmem:[%s961_s1 + $0x98] sm:$0xff]   ;;  %v739_v23 = vld [vmem:[%s961_s1 + $0x90] sm:$0xff]  }
   0x9   :  { %679 = vmatpush3.bf16.msra.mxu1 %v723_v7  ;;  %640 = vmatprep.subr.bf16.mxu0 %v724_v8  ;;  %v740_v24 = vld [vmem:[%s961_s1 + $0x48] sm:$0xff]   ;;  %v744_v28 = vld [vmem:[%s961_s1 + $0x40] sm:$0xff]  }
   0xa   :  { %680 = vmatprep.subr.bf16.mxu1 %v725_v9  ;;  %v741_v25 = vld [vmem:[%s961_s1 + $0xc8] sm:$0xff]   ;;  %v745_v29 = vld [vmem:[%s961_s1 + $0xc0] sm:$0xff]  }
   0xb   :  { %v742_v26 = vld [vmem:[%s961_s1 + $0x8] sm:$0xff]   ;;  %v746_v30 = vld [vmem:[%s961_s1] sm:$0xff]  }
   0xc   :  { %641 = vmatpush3.bf16.msra.mxu0 %v726_v10  ;;  %v743_v27 = vld [vmem:[%s961_s1 + $0x88] sm:$0xff]   ;;  %v747_v31 = vld [vmem:[%s961_s1 + $0x80] sm:$0xff]  }
   0xd   :  { %681 = vmatpush3.bf16.msra.mxu1 %v727_v11  ;;  %642 = vmatprep.subr.bf16.mxu0 %v728_v12  ;;  %v748_v32 = vld [vmem:[%s962_s0] ss:$16 sps:$4 sm:$0xff]   ;;  %v750_v33 = vld [vmem:[%s962_s0 + $0x4] ss:$16 sps:$4 sm:$0xff]   ;;  %v751_v34 = vld [vmem:[%s962_s0 + $0x8] ss:$16 sps:$4 sm:$0xff]  }
   0xe   :  { %682 = vmatprep.subr.bf16.mxu1 %v729_v13  ;;  %v753_v35 = vld [vmem:[%s962_s0 + $0xc] ss:$16 sps:$4 sm:$0xff]   ;;  %406 = vmatprep.mubr.bf16.mxu0 %v750_v33  ;;  %v754_v36 = vld [vmem:[%s962_s0 + $0x24] ss:$16 sps:$4 sm:$0xff]   ;;  %v758_v38 = vld [vmem:[%s962_s0 + $0x20] ss:$16 sps:$4 sm:$0xff]  }
   0xf   :  { %471 = vmatprep.mubr.bf16.mxu1 %v753_v35  ;;  %v756_v37 = vld [vmem:[%s962_s0 + $0x2c] ss:$16 sps:$4 sm:$0xff]   ;;  %v759_v39 = vld [vmem:[%s962_s0 + $0x28] ss:$16 sps:$4 sm:$0xff]   ;;  %v760_v40 = vld [vmem:[%s962_s0 + $0x44] ss:$16 sps:$4 sm:$0xff]  }
  0x10   :  { %643 = vmatpush3.bf16.msra.mxu0 %v730_v14  ;;  %v762_v41 = vld [vmem:[%s962_s0 + $0x4c] ss:$16 sps:$4 sm:$0xff]   ;;  %v764_v42 = vld [vmem:[%s962_s0 + $0x40] ss:$16 sps:$4 sm:$0xff]   ;;  %v765_v43 = vld [vmem:[%s962_s0 + $0x48] ss:$16 sps:$4 sm:$0xff]  }
  0x11   :  { %683 = vmatpush3.bf16.msra.mxu1 %v731_v15  ;;  %644 = vmatprep.subr.bf16.mxu0 %v732_v16  ;;  %v766_v44 = vld [vmem:[%s962_s0 + $0x64] ss:$16 sps:$4 sm:$0xff]   ;;  %v768_v45 = vld [vmem:[%s962_s0 + $0x6c] ss:$16 sps:$4 sm:$0xff]   ;;  %v770_v46 = vld [vmem:[%s962_s0 + $0x60] ss:$16 sps:$4 sm:$0xff]  }
  0x12   :  { %684 = vmatprep.subr.bf16.mxu1 %v733_v17  ;;  %v771_v47 = vld [vmem:[%s962_s0 + $0x68] ss:$16 sps:$4 sm:$0xff]   ;;  %v939_v53 = vld [vmem:[%s963_s2] ss:$0 sm:$0xff] }
  0x14   :  { %645 = vmatpush3.bf16.msra.mxu0 %v734_v18 }
  0x15   :  { %685 = vmatpush3.bf16.msra.mxu1 %v735_v19  ;;  %646 = vmatprep.subr.bf16.mxu0 %v736_v20 }
  0x16   :  { %686 = vmatprep.subr.bf16.mxu1 %v737_v21 }
  0x18   :  { %647 = vmatpush3.bf16.msra.mxu0 %v738_v22 }
  0x19   :  { %687 = vmatpush3.bf16.msra.mxu1 %v739_v23  ;;  %648 = vmatprep.subr.bf16.mxu0 %v740_v24 }
  0x1a   :  { %688 = vmatprep.subr.bf16.mxu1 %v741_v25 }
  0x1c   :  { %649 = vmatpush3.bf16.msra.mxu0 %v742_v26 }
  0x1d   :  { %689 = vmatpush3.bf16.msra.mxu1 %v743_v27  ;;  %650 = vmatprep.subr.bf16.mxu0 %v744_v28 }
  0x1e   :  { %690 = vmatprep.subr.bf16.mxu1 %v745_v29 }
  0x20   :  { %651 = vmatpush3.bf16.msra.mxu0 %v746_v30 }
  0x21   :  { %691 = vmatpush3.bf16.msra.mxu1 %v747_v31 }
  0x23   :  { %407 = vmatmul.mubr.bf16.vlgmr.msra.gmra.mxu0 %v748_v32 }
  0x24   :  { %472 = vmatmul.mubr.bf16.vlgmr.msra.gmra.mxu1 %v751_v34  ;;  %414 = vmatprep.mubr.bf16.mxu0 %v754_v36 }
  0x25   :  { %479 = vmatprep.mubr.bf16.mxu1 %v756_v37 }
  0x2b   :  { %415 = vmatmul.mubr.bf16.gmra.mxu0 %v758_v38 }
  0x2c   :  { %480 = vmatmul.mubr.bf16.gmra.mxu1 %v759_v39  ;;  %422 = vmatprep.mubr.bf16.mxu0 %v760_v40 }
  0x2d   :  { %487 = vmatprep.mubr.bf16.mxu1 %v762_v41 }
  0x33   :  { %423 = vmatmul.mubr.bf16.gmra.mxu0 %v764_v42 }
  0x34   :  { %488 = vmatmul.mubr.bf16.gmra.mxu1 %v765_v43  ;;  %430 = vmatprep.mubr.bf16.mxu0 %v766_v44 }
  0x35   :  { %495 = vmatprep.mubr.bf16.mxu1 %v768_v45 }
  0x3b   :  { %431 = vmatmul.mubr.bf16.gmra.mxu0 %v770_v46 }
  0x3c   :  { %496 = vmatmul.mubr.bf16.gmra.mxu1 %v771_v47 }
  0xe3   :  { %v652_v48 = vpop.f32.mrf.mxu0 }
  0xe4   :  { %v692_v49 = vpop.f32.mrf.mxu1 }
  0xe5   :  { %v653_v50 = vpop.f32.mrf.mxu0 }
  0xe6   :  { %v654_v51 = vadd.f32 %v653_v50, %v652_v48  ;;  %v693_v52 = vpop.f32.mrf.mxu1 }
  0xe7   :  { %v655_v54 = vpop.f32.mrf.mxu0  ;;  %v694_v61 = vadd.f32 %v693_v52, %v692_v49 }
  0xe8   :  { %v695_v55 = vpop.f32.mrf.mxu1  ;;  %v409_v57 = vadd.f32 %v654_v51, %v939_v53 }
  0xe9   :  { %v656_v56 = vpop.f32.mrf.mxu0 }
  0xea   :  { %v657_v58 = vadd.f32 %v656_v56, %v655_v54  ;;  %v696_v59 = vpop.f32.mrf.mxu1  ;;  %v474_v2 = vadd.f32 %v694_v61, %v409_v57 }
  0xeb   :  { %v658_v60 = vpop.f32.mrf.mxu0  ;;  %v697_v63 = vadd.f32 %v696_v59, %v695_v55 }
  0xec   :  { %v412_v62 = vadd.f32 %v657_v58, %v939_v53  ;;  %v698_v0 = vpop.f32.mrf.mxu1 }
  0xed   :  { %v659_v1 = vpop.f32.mrf.mxu0 }
  0xee   :  { %v477_v3 = vadd.f32 %v697_v63, %v412_v62  ;;  %v660_v4 = vadd.f32 %v659_v1, %v658_v60  ;;  %v699_v5 = vpop.f32.mrf.mxu1 }
  0xef   :  { %v661_v6 = vpop.f32.mrf.mxu0  ;;  %v700_v14 = vadd.f32 %v699_v5, %v698_v0 }
  0xf0   :  { %v616_v7 = vpack.c.bf16 %v477_v3, %v474_v2  ;;  %v701_v8 = vpop.f32.mrf.mxu1  ;;  %v417_v10 = vadd.f32 %v660_v4, %v939_v53 }
  0xf1   :  { %v662_v9 = vpop.f32.mrf.mxu0 }
  0xf2   :  { %617 = vst [vmem:[%s964_s3] sm:$0xff] %v616_v7   ;;  %v663_v11 = vadd.f32 %v662_v9, %v661_v6  ;;  %v702_v12 = vpop.f32.mrf.mxu1  ;;  %v482_v19 = vadd.f32 %v700_v14, %v417_v10 }
  0xf3   :  { %v664_v13 = vpop.f32.mrf.mxu0  ;;  %v703_v16 = vadd.f32 %v702_v12, %v701_v8 }
  0xf4   :  { %v420_v15 = vadd.f32 %v663_v11, %v939_v53  ;;  %v704_v17 = vpop.f32.mrf.mxu1 }
  0xf5   :  { %v665_v18 = vpop.f32.mrf.mxu0 }
  0xf6   :  { %v485_v20 = vadd.f32 %v703_v16, %v420_v15  ;;  %v666_v21 = vadd.f32 %v665_v18, %v664_v13  ;;  %v705_v22 = vpop.f32.mrf.mxu1 }
  0xf7   :  { %v667_v23 = vpop.f32.mrf.mxu0  ;;  %v706_v31 = vadd.f32 %v705_v22, %v704_v17 }
  0xf8   :  { %v621_v24 = vpack.c.bf16 %v485_v20, %v482_v19  ;;  %v707_v25 = vpop.f32.mrf.mxu1  ;;  %v425_v27 = vadd.f32 %v666_v21, %v939_v53 }
  0xf9   :  { %v668_v26 = vpop.f32.mrf.mxu0 }
  0xfa   :  { %633 = vst [vmem:[%s964_s3 + $0x8] sm:$0xff] %v621_v24   ;;  %v669_v28 = vadd.f32 %v668_v26, %v667_v23  ;;  %v708_v29 = vpop.f32.mrf.mxu1  ;;  %v490_v36 = vadd.f32 %v706_v31, %v425_v27 }
  0xfb   :  { %v670_v30 = vpop.f32.mrf.mxu0  ;;  %v709_v33 = vadd.f32 %v708_v29, %v707_v25 }
  0xfc   :  { %v428_v32 = vadd.f32 %v669_v28, %v939_v53  ;;  %v710_v34 = vpop.f32.mrf.mxu1 }
  0xfd   :  { %v671_v35 = vpop.f32.mrf.mxu0 }
  0xfe   :  { %v493_v37 = vadd.f32 %v709_v33, %v428_v32  ;;  %v672_v38 = vadd.f32 %v671_v35, %v670_v30  ;;  %v711_v39 = vpop.f32.mrf.mxu1 }
  0xff   :  { %v673_v40 = vpop.f32.mrf.mxu0  ;;  %v712_v47 = vadd.f32 %v711_v39, %v710_v34 }
 0x100   :  { %v626_v41 = vpack.c.bf16 %v493_v37, %v490_v36  ;;  %v713_v42 = vpop.f32.mrf.mxu1  ;;  %v433_v44 = vadd.f32 %v672_v38, %v939_v53 }
 0x101   :  { %v674_v43 = vpop.f32.mrf.mxu0 }
 0x102   :  { %634 = vst [vmem:[%s964_s3 + $0x10] sm:$0xff] %v626_v41   ;;  %v675_v45 = vadd.f32 %v674_v43, %v673_v40  ;;  %v714_v46 = vpop.f32.mrf.mxu1  ;;  %v498_v50 = vadd.f32 %v712_v47, %v433_v44 }
 0x103   :  { %v715_v49 = vadd.f32 %v714_v46, %v713_v42 }
 0x104   :  { %v436_v48 = vadd.f32 %v675_v45, %v939_v53 }
 0x106   :  { %v501_v51 = vadd.f32 %v715_v49, %v436_v48 }
 0x108   :  { %v631_v52 = vpack.c.bf16 %v501_v51, %v498_v50 }
 0x10a   :  { %635 = vst [vmem:[%s964_s3 + $0x18] sm:$0xff] %v631_v52  }

// kernel: squeeze.5
= control target key start
LH: loop header
LB: loop body
LE: loop exit
PB: predicated region body
PF: predicated region fallthrough
CT: control target
= control target key end

     0   :  { %s83_s8 = smov 122   ;;  %vm8_vm0 = vcmask 15360   ;;  %s84_s11 = smov 124   ;;  %s144_s0 = inlined_call_operand.vmem [shape: f32[20], index: 0, kind: input, shape index: {}]   ;;  %s145_s1 = inlined_call_operand.vmem [shape: f32[2,5,2], index: 1, kind: output, shape index: {}]  }
   0x1   :  { %v5_v0 = vld [vmem:[%s144_s0] sm:$0x1]  ;;  %s82_s0 = smov 126   ;;  %s85_s12 = smov 120  }
   0x2   :  { %6 = vst [vmem:[#allocation0] sm:$0x1] %v5_v0  ;;  %s86_s13 = smov 118   ;;  %s87_s14 = smov 116  }
   0x3   :  { %s88_s15 = smov 114   ;;  %s89_s16 = smov 112  }
   0x4   :  { %s90_s17 = smov 110  }
   0x9   :  { %v10_v1 = vld [vmem:[#allocation0] sm:$0x1]  }
   0xa   :  { %v22_v2 = vld [vmem:[#allocation0] sm:$0x1]   ;;  %11 = vrot.lane.b32.xlu0 %v10_v1, %s82_s0 }
   0xb   :  { %23 = vrot.lane.b32.xlu1 %v22_v2, %s83_s8  ;;  %v16_v3 = vld [vmem:[#allocation0] sm:$0x1]  }
   0xc   :  { %v28_v4 = vld [vmem:[#allocation0] sm:$0x1]  }
   0xd   :  { %v7_v5 = vld [vmem:[#allocation0] sm:$0x1]  }
   0xe   :  { %9 = vst.msk [vmem:[%s145_s1] sm:$0x1] %vm8_vm0, %v7_v5   ;;  %17 = vrot.lane.b32.xlu0 %v16_v3, %s84_s11  ;;  %v34_v6 = vld [vmem:[#allocation0] sm:$0x1]  }
   0xf   :  { %29 = vrot.lane.b32.xlu1 %v28_v4, %s85_s12  ;;  %v40_v7 = vld [vmem:[#allocation0] sm:$0x1]  }
  0x10   :  { %v46_v8 = vld [vmem:[#allocation0] sm:$0x1]  }
  0x11   :  { %v52_v9 = vld [vmem:[#allocation0] sm:$0x1]  }
  0x12   :  { %35 = vrot.lane.b32.xlu0 %v34_v6, %s86_s13  ;;  %v58_v10 = vld [vmem:[#allocation0] sm:$0x1]  }
  0x13   :  { %41 = vrot.lane.b32.xlu1 %v40_v7, %s87_s14 }
  0x16   :  { %47 = vrot.lane.b32.xlu0 %v46_v8, %s88_s15 }
  0x17   :  { %53 = vrot.lane.b32.xlu1 %v52_v9, %s89_s16 }
  0x1a   :  { %59 = vrot.lane.b32.xlu0 %v58_v10, %s90_s17 }
  0x7c   :  { %v12_v11 = vpop.permute.xlu0 %11  }
  0x7d   :  { %v24_v12 = vpop.permute.xlu1 %23   ;;  %64 = vst.msk [vmem:[%s145_s1 + $0x1] sm:$0x1] %vm8_vm0, %v12_v11  }
  0x7e   :  { %66 = vst.msk [vmem:[%s145_s1 + $0x3] sm:$0x1] %vm8_vm0, %v24_v12  }
  0x80   :  { %v18_v13 = vpop.permute.xlu0 %17  }
  0x81   :  { %v30_v14 = vpop.permute.xlu1 %29   ;;  %65 = vst.msk [vmem:[%s145_s1 + $0x2] sm:$0x1] %vm8_vm0, %v18_v13  }
  0x82   :  { %67 = vst.msk [vmem:[%s145_s1 + $0x4] sm:$0x1] %vm8_vm0, %v30_v14  }
  0x84   :  { %v36_v15 = vpop.permute.xlu0 %35  }
  0x85   :  { %v42_v16 = vpop.permute.xlu1 %41   ;;  %68 = vst.msk [vmem:[%s145_s1 + $0x8] sm:$0x1] %vm8_vm0, %v36_v15  }
  0x86   :  { %69 = vst.msk [vmem:[%s145_s1 + $0x9] sm:$0x1] %vm8_vm0, %v42_v16  }
  0x88   :  { %v48_v17 = vpop.permute.xlu0 %47  }
  0x89   :  { %v54_v18 = vpop.permute.xlu1 %53   ;;  %70 = vst.msk [vmem:[%s145_s1 + $0xa] sm:$0x1] %vm8_vm0, %v48_v17  }
  0x8a   :  { %71 = vst.msk [vmem:[%s145_s1 + $0xb] sm:$0x1] %vm8_vm0, %v54_v18  }
  0x8c   :  { %v60_v19 = vpop.permute.xlu0 %59  }
  0x8d   :  { %72 = vst.msk [vmem:[%s145_s1 + $0xc] sm:$0x1] %vm8_vm0, %v60_v19  }

// kernel: attn_model_forward.8
= control target key start
LH: loop header
LB: loop body
LE: loop exit
PB: predicated region body
PF: predicated region fallthrough
CT: control target
= control target key end

     0   :  { %s559_s12 = smov 0   ;;  %s561_s13 = smov 0   ;;  %s623_s0 = inlined_call_operand.vmem [shape: bf16[24,128], index: 0, kind: input, shape index: {}]   ;;  %s624_s1 = inlined_call_operand.vmem [shape: bf16[128,128], index: 1, kind: input, shape index: {}]   ;;  %s625_s2 = inlined_call_operand.vmem [shape: f32[1,128], index: 2, kind: input, shape index: {}]   ;;  %s626_s3 = inlined_call_operand.vmem [shape: f32[24,128], index: 3, kind: output, shape index: {}]  }
   0x1   :  { %s563_s14 = smov 0  }
   0x2 LB: > { %s25_s15 = sadd.s32 1, %s531_s13  ;;  %p436_p0 = scmp.ge.s32.totalorder %s535_s14, 1  ;;  %s535_s14 = sphi %s563_s14, %s13_s14   ;;  %s531_s13 = sphi %s561_s13, %s628_s13   ;;  %s527_s12 = sphi %s559_s12, %s627_s12  }
   0x3   : > { %p27_p1 = scmp.ge.s32.totalorder %s25_s15, 3  ;;  %p167_p2 = scmp.lt.s32.totalorder %s535_s14, 4 }
   0x5   : > { %s630_s15 = smov (%p27_p1, %s25_s15), 0  ;;  %p168_p3 = pnand %p436_p0, %p167_p2 }
   0x6   : > { %p199_p4 = scmp.lt.s32.totalorder (!%p168_p3), %s527_s12, 2 }
   0x7   : > { %171 = sbr.rel (%p168_p3) target bundleno = 244 (0xf4), region = 32 }
   0xc   : > { %v505_v0 = vld [vmem:[%s624_s1 + $0x38] sm:$0xff]   ;;  %v537_v1 = vmov 0.0   ;;  %v506_v2 = vld [vmem:[%s624_s1 + $0x30] sm:$0xff]   ;;  %vm538_vm0 = vmmov 0   ;;  %v507_v3 = vld [vmem:[%s624_s1 + $0x28] sm:$0xff]   ;;  %s632_s12 = smov (!%p199_p4, %s527_s12), 2 }
   0xd   : > { %459 = vmatprep.subr.bf16.mxu0 %v537_v1  ;;  %475 = vmatprep.mubr.msk.bf16.mxu0 %vm538_vm0, %v537_v1  ;;  %v508_v4 = vld [vmem:[%s624_s1 + $0x20] sm:$0xff]   ;;  %v509_v5 = vld [vmem:[%s624_s1 + $0x18] sm:$0xff]   ;;  %v510_v6 = vld [vmem:[%s624_s1 + $0x10] sm:$0xff]   ;;  %s437_s30 = sshll.u32 %s632_s12, 2  ;;  %s438_s9 = sshll.u32 %s632_s12, 3 }
   0xe   : > { %460 = vmatpush3.bf16.msra.mxu0 %v505_v0  ;;  %v511_v7 = vld [vmem:[%s624_s1 + $0x8] sm:$0xff]   ;;  %v512_v8 = vld [vmem:[%s624_s1] sm:$0xff]   ;;  %s202_s8 = scalar_lea.vmem %s623_s0, %s437_s30  ;;  %s216_s18 = scalar_lea.vmem %s626_s3, %s438_s9 }
   0xf   : > { %461 = vmatprep.subr.bf16.mxu0 %v537_v1  ;;  %v218_v9 = vld [vmem:[%s202_s8] sm:$0xf] }
  0x10   : > { %v439_v10 = vld [vmem:[%s625_s2] ss:$0 sm:$0xff] }
  0x12   : > { %462 = vmatpush3.bf16.msra.mxu0 %v506_v2 }
  0x13   : > { %463 = vmatprep.subr.bf16.mxu0 %v537_v1 }
  0x16   : > { %464 = vmatpush3.bf16.msra.mxu0 %v507_v3 }
  0x17   : > { %465 = vmatprep.subr.bf16.mxu0 %v537_v1 }
  0x1a   : > { %466 = vmatpush3.bf16.msra.mxu0 %v508_v4 }
  0x1b   : > { %467 = vmatprep.subr.bf16.mxu0 %v537_v1 }
  0x1e   : > { %468 = vmatpush3.bf16.msra.mxu0 %v509_v5 }
  0x1f   : > { %469 = vmatprep.subr.bf16.mxu0 %v537_v1 }
  0x22   : > { %470 = vmatpush3.bf16.msra.mxu0 %v510_v6 }
  0x23   : > { %471 = vmatprep.subr.bf16.mxu0 %v537_v1 }
  0x26   : > { %472 = vmatpush3.bf16.msra.mxu0 %v511_v7 }
  0x27   : > { %473 = vmatprep.subr.bf16.mxu0 %v537_v1 }
  0x2a   : > { %474 = vmatpush3.bf16.msra.mxu0 %v512_v8 }
  0x2d   : > { %476 = vmatmul.mubr.bf16.vlgmr.msra.gmra.mxu0 %v218_v9 }
  0xed   : > { %v324_v11 = vpop.f32.mrf.mxu0 }
  0xee   : > { %v325_v12 = vadd.f32 %v439_v10, %v324_v11 }
  0xef   : > { %v477_v13 = vpop.f32.mrf.mxu0 }
  0xf0   : > { %330 = vst [vmem:[%s216_s18] sm:$0xff] %v325_v12 }
  0xf1   : > { %v327_v14 = vpop.f32.mrf.mxu0 }
  0xf3   : > { %v478_v15 = vpop.f32.mrf.mxu0 }
  0xf4 PF: > { %s13_s14 = sadd.s32 1, %s535_s14   ;;  %s627_s12 = smov %s531_s13 }
  0xf5   : > { %p10_p5 = scmp.ge.s32.totalorder %s13_s14, 5   ;;  %s628_s13 = smov %s630_s15 }
  0xf7   :  { %12 = sbr.rel (!%p10_p5) target bundleno = 2 (0x2), region = 68 }

// kernel: attn_model_forward.9
= control target key start
LH: loop header
LB: loop body
LE: loop exit
PB: predicated region body
PF: predicated region fallthrough
CT: control target
= control target key end

     0   :  { %s297_s9 = smov 0   ;;  %s322_s0 = inlined_call_operand.vmem [shape: f32[24,128], index: 0, kind: input, shape index: {}]   ;;  %s323_s1 = inlined_call_operand.vmem [shape: s32[24,1], index: 1, kind: input, shape index: {}]   ;;  %s324_s2 = inlined_call_operand.vmem [shape: f32[24,1], index: 2, kind: output, shape index: {}]  }
   0x1 LB: > { %s249_s10 = sadd.s32 4294967295, %s279_s9   ;;  %p253_p0 = scmp.ge.s32.totalorder %s279_s9, 1  ;;  %s279_s9 = sphi %s297_s9, %s12_s9  }
   0x2   : > { %p120_p1 = scmp.lt.s32.totalorder %s279_s9, 4 }
   0x4   : > { %p121_p2 = pnand %p253_p0, %p120_p1 }
   0x5   : > { %p144_p3 = scmp.lt.s32.totalorder (!%p121_p2), %s249_s10, 2 }
   0x6   : > { %124 = sbr.rel (%p121_p2) target bundleno = 333 (0x14d), region = 28 }
   0xb   : > { %v158_v0 = vlaneseq  ;;  %v281_v1 = vmov 0   ;;  %s326_s10 = smov (!%p144_p3, %s249_s10), 2  ;;  %vm182_vm3 = vcmask 7168  }
   0xc   : > { %268 = vset.pattern.permute.xlu0 %v281_v1  ;;  %s305_s11 = sshll.u32 %s326_s10, 3 }
   0xd   : > { %v159_v2 = vand.u32 127, %v158_v0  ;;  %s147_s14 = scalar_lea.vmem %s322_s0, %s305_s11  ;;  %s151_s17 = scalar_lea.vmem %s323_s1, %s305_s11 }
   0xe   : > { %v156_v3 = vld [vmem:[%s147_s14] sm:$0xff]  ;;  %s155_s20 = scalar_lea.vmem %s324_s2, %s305_s11 }
   0xf   : > { %vm160_vm0 = vcmp.lt.s32.totalorder %v159_v2, 16  ;;  %v157_v5 = vld [vmem:[%s151_s17] sm:$0xff] }
  0x10   : > { %v161_v4 = vsel %vm160_vm0, %v156_v3, -1e+30  ;;  %vm180_vm2 = vcmp.ne.s32.totalorder %v157_v5, 0 }
  0x11   : > { %162 = vmax.xlane.f32.xlu0 %v161_v4 }
  0x27   : > { %173 = vperm.xlu0 %268, %v157_v5  }
  0x9a   : > { %v163_v6 = vpop.xlane.xlu0 %162 }
  0x9b   : > { %v164_v7 = vsub.f32 %v161_v4, %v163_v6 }
  0x9d   : > { %v165_v8 = vmul.f32 1.442695, %v164_v7 }
  0x9f   : > { %269 = vpow2.f32 %v165_v8 }
  0xa2   : > { %v174_v9 = vpop.permute.xlu0 %173 }
  0xa3   : > { %vm175_vm1 = vcmp.eq.s32.totalorder %v159_v2, %v174_v9 }
  0xa4   : > { %v176_v11 = vsel %vm175_vm1, %v161_v4, 0.0 }
  0xac   : > { %v270_v10 = vpop.eup %269 }
  0xad   : > { %167 = vadd.xlane.f32.xlu1 %v270_v10 }
  0xb1   : > { %177 = vadd.xlane.f32.xlu1 %v176_v11 }
 0x136   : > { %v168_v12 = vpop.xlane.xlu1 %167 }
 0x137   : > { %271 = vlog2.f32 %v168_v12 }
 0x13a   : > { %v178_v15 = vpop.xlane.xlu1 %177 }
 0x144   : > { %v272_v13 = vpop.eup %271 }
 0x145   : > { %v170_v14 = vmul.f32 0.6931472, %v272_v13 }
 0x147   : > { %v171_v16 = vadd.f32 %v170_v14, %v163_v6 }
 0x149   : > { %v179_v17 = vsub.f32 %v171_v16, %v178_v15 }
 0x14b   : > { %v181_v18 = vsel %vm180_vm2, %v179_v17, 0.0 }
 0x14c   : > { %183 = vst.msk [vmem:[%s155_s20] sm:$0xff] %vm182_vm3, %v181_v18 }
 0x14d PF: > { %s12_s9 = sadd.s32 1, %s279_s9  }
 0x14e   : > { %p9_p4 = scmp.ge.s32.totalorder %s12_s9, 5  }
 0x150   :  { %11 = sbr.rel (!%p9_p4) target bundleno = 1 (0x1), region = 61 }

// kernel: attn_model_forward.7
= control target key start
LH: loop header
LB: loop body
LE: loop exit
PB: predicated region body
PF: predicated region fallthrough
CT: control target
= control target key end

     0   :  { %s3119_s30 = smov 0   ;;  %s3121_s10 = smov 0   ;;  %s3927_s0 = inlined_call_operand.vmem [shape: bf16[2,32,512], index: 0, kind: input, shape index: {}]   ;;  %s3928_s1 = inlined_call_operand.vmem [shape: bf16[2,32,128], index: 1, kind: input, shape index: {}]   ;;  %s3929_s2 = inlined_call_operand.vmem [shape: bf16[2,5,2,512], index: 2, kind: input, shape index: {}]   ;;  %s3930_s3 = inlined_call_operand.vmem [shape: bf16[128,128], index: 3, kind: input, shape index: {}]   ;;  %s3931_s4 = inlined_call_operand.vmem [shape: f32[1,128], index: 4, kind: input, shape index: {}]   ;;  %s3932_s5 = inlined_call_operand.vmem [shape: f32[1,128], index: 5, kind: input, shape index: {}]   ;;  %s3933_s6 = inlined_call_operand.vmem [shape: bf16[512,512], index: 6, kind: input, shape index: {}]   ;;  %s3934_s7 = inlined_call_operand.vmem [shape: bf16[128,512], index: 7, kind: input, shape index: {}]   ;;  %s3935_s8 = inlined_call_operand.vmem [shape: f32[1,512], index: 8, kind: input, shape index: {}]   ;;  %s3936_s9 = inlined_call_operand.vmem [shape: bf16[2,5,2,128], index: 9, kind: output, shape index: {}]  }
   0x1   :  { %s3123_s11 = smov 0  }
   0x2 LB: > { %s28_s12 = sadd.s32 1, %s3053_s10  ;;  %p2464_p0 = scmp.ge.s32.totalorder %s3057_s11, 1  ;;  %s3057_s11 = sphi %s3123_s11, %s19_s11   ;;  %s3053_s10 = sphi %s3121_s10, %s3938_s10   ;;  %s3049_s30 = sphi %s3119_s30, %s3937_s30  }
   0x3   : > { %p29_p1 = scmp.ge.s32.totalorder %s28_s12, 2  ;;  %p330_p2 = scmp.lt.s32.totalorder %s3057_s11, 3 }
   0x5   : > { %s3940_s12 = smov (%p29_p1, %s28_s12), 0  ;;  %p331_p3 = pnand %p2464_p0, %p330_p2 }
   0x6   : > { %p397_p4 = scmp.lt.s32.totalorder (!%p331_p3), %s3049_s30, 1  ;;  %s3162_s27 = smov (!%p331_p3), 0  }
   0x7   : > { %334 = sbr.rel (%p331_p3) target bundleno = 1375 (0x55f), region = 56 }
   0xc   : > { %v3140_v0 = vld [vmem:[%s3931_s4] ss:$0 sm:$0xff]  ;;  %v3063_v3 = vmov 0.0   ;;  %s3942_s30 = smov (!%p397_p4, %s3049_s30), 1 }
   0xd   : > { %v3145_v1 = vld [vmem:[%s3935_s8] sm:$0xf]  ;;  %416 = vst [vmem:[#allocation2] sm:$0x3] %v3063_v3  ;;  %417 = vst [vmem:[#allocation3] sm:$0x3] %v3063_v3 }
   0xe   : > { %v3150_v2 = vld [vmem:[%s3932_s5] ss:$0 sm:$0xff]  ;;  %s2689_s19 = smul.u32 20, %s3942_s30 }
   0xf   : > { %s2690_s20 = smul.u32 5, %s3942_s30 }
  0x10   : > { %s3155_s23 = scalar_lea.vmem %s3929_s2, %s2689_s19 }
  0x11   : > { %s3160_s26 = scalar_lea.vmem %s3936_s9, %s2690_s20 }
  0x12 LB: >> { %v2731_v4 = vld [vmem:[%s3930_s3 + $0x38] sm:$0xff]   ;;  %v3064_v5 = vmov 0.0   ;;  %v2732_v6 = vld [vmem:[%s3930_s3 + $0x30] sm:$0xff]   ;;  %vm3065_vm0 = vmmov 0   ;;  %v2733_v7 = vld [vmem:[%s3930_s3 + $0x28] sm:$0xff]   ;;  %v557_v17 = vlaneseq  ;;  %vm651_vm1 = vcmask 130112   ;;  %s2340_s13 = scalar_lea.vmem %s3160_s26, %s3061_s27  ;;  %s3061_s27 = sphi %s3162_s27, %s423_s27  }
  0x13   : >> { %2669 = vmatprep.subr.bf16.mxu0 %v3064_v5  ;;  %2685 = vmatprep.mubr.msk.bf16.mxu0 %vm3065_vm0, %v3064_v5  ;;  %v2734_v8 = vld [vmem:[%s3930_s3 + $0x20] sm:$0xff]   ;;  %v2735_v9 = vld [vmem:[%s3930_s3 + $0x18] sm:$0xff]   ;;  %v2736_v10 = vld [vmem:[%s3930_s3 + $0x10] sm:$0xff]   ;;  %v3066_v15 = vmov 1966171168   ;;  %vm658_vm2 = vcmask 195712  }
  0x14   : >> { %2670 = vmatpush3.bf16.msra.mxu0 %v2731_v4  ;;  %v2737_v11 = vld [vmem:[%s3930_s3 + $0x8] sm:$0xff]   ;;  %v2738_v12 = vld [vmem:[%s3930_s3] sm:$0xff]   ;;  %v555_v16 = vunpack.c.l.s4 %v3066_v15  ;;  %v3195_v19 = vshrl.u32 %v557_v17, 7  ;;  %v2658_v28 = vld [vmem:[%s3928_s1 + $0x10] sm:$0xff]   ;;  %vm665_vm3 = vcmask 261312   ;;  %vm686_vm4 = vcmask 1041409  }
  0x15   : >> { %2671 = vmatprep.subr.bf16.mxu0 %v3064_v5  ;;  %v424_v13 = vld [vmem:[#allocation2] sm:$0x3]  ;;  %v2657_v34 = vld [vmem:[%s3928_s1 + $0x8] sm:$0xff]   ;;  %v2651_v37 = vunpack.c.l.bf16 %v2658_v28  ;;  %v2652_v38 = vunpack.c.h.bf16 %v2658_v28  ;;  %v2659_v39 = vld [vmem:[%s3928_s1 + $0x18] sm:$0xff]   ;;  %vm689_vm5 = vcmask 254976   ;;  %s2635_s29 = sshll.u32 %s3061_s27, 2 }
  0x16   : >> { %v3191_v14 = vpack.c.bf16 %v424_v13, %v424_v13  ;;  %v556_v18 = vunpack.c.0.s8 %v555_v16  ;;  %v2642_v24 = vld [vmem:[%s3928_s1] sm:$0xff]   ;;  %v3203_v26 = vsub.s32 0, %v3195_v19  ;;  %v2647_v43 = vunpack.c.l.bf16 %v2657_v34  ;;  %s2259_s30 = scalar_lea.vmem %s3155_s23, %s2635_s29  ;;  %s423_s27 = sadd.s32 1, %s3061_s27  }
  0x17   : >> { %v2643_v31 = vunpack.c.l.bf16 %v2642_v24  ;;  %v2644_v32 = vunpack.c.h.bf16 %v2642_v24  ;;  %v2655_v46 = vunpack.c.l.bf16 %v2659_v39  ;;  %v2648_v48 = vunpack.c.h.bf16 %v2657_v34  ;;  %p420_p5 = scmp.ge.s32.totalorder %s423_s27, 5  }
  0x18   : >> { %2672 = vmatpush3.bf16.msra.mxu0 %v2732_v6  ;;  %v559_v20 = vsub.s32 %v556_v18, %v3195_v19  ;;  %v2656_v50 = vunpack.c.h.bf16 %v2659_v39 }
  0x19   : >> { %2673 = vmatprep.subr.bf16.mxu0 %v3064_v5 }
  0x1c   : >> { %2674 = vmatpush3.bf16.msra.mxu0 %v2733_v7 }
  0x1d   : >> { %2675 = vmatprep.subr.bf16.mxu0 %v3064_v5 }
  0x20   : >> { %2676 = vmatpush3.bf16.msra.mxu0 %v2734_v8 }
  0x21   : >> { %2677 = vmatprep.subr.bf16.mxu0 %v3064_v5 }
  0x24   : >> { %2678 = vmatpush3.bf16.msra.mxu0 %v2735_v9  ;;  %v641_v9 = vand.u32 127, %v557_v17 }
  0x25   : >> { %2679 = vmatprep.subr.bf16.mxu0 %v3064_v5 }
  0x26   : >> { %v653_v13 = vadd.s32 4294967280, %v641_v9  ;;  %v660_v15 = vadd.s32 4294967272, %v641_v9 }
  0x28   : >> { %2680 = vmatpush3.bf16.msra.mxu0 %v2736_v10 }
  0x29   : >> { %2681 = vmatprep.subr.bf16.mxu0 %v3064_v5 }
  0x2c   : >> { %2682 = vmatpush3.bf16.msra.mxu0 %v2737_v11  ;;  %v646_v11 = vadd.s32 4294967288, %v641_v9 }
  0x2d   : >> { %2683 = vmatprep.subr.bf16.mxu0 %v3064_v5 }
  0x2e   : >> { %v3226_v18 = vsub.s32 %v646_v11, %v3195_v19 }
  0x30   : >> { %2684 = vmatpush3.bf16.msra.mxu0 %v2738_v12 }
  0x33   : >> { %2686 = vmatmul.mubr.bf16.vlgmr.msra.gmra.mxu0 %v3191_v14 }
  0xf3   : >> { %v531_v21 = vpop.f32.mrf.mxu0 }
  0xf4   : >> { %v532_v22 = vadd.f32 %v3140_v0, %v531_v21 }
  0xf5   : >> { %v2687_v23 = vpop.f32.mrf.mxu0 }
  0xf6   : >> { %v560_v25 = vrot.slane %v532_v22, %v559_v20  ;;  %v3232_v22 = vsub.s32 %v641_v9, %v3195_v19  ;;  %v3235_v23 = vsub.s32 %v660_v15, %v3195_v19 }
  0xf7   : >> { %v534_v27 = vpop.f32.mrf.mxu0 }
  0xf8   : >> { %v561_v29 = vcombine.high %v560_v25, %v560_v25  ;;  %v568_v30 = vrot.slane %v560_v25, %v559_v20 }
  0xf9   : >> { %v2688_v33 = vpop.f32.mrf.mxu0 }
  0xfa   : >> { %v575_v35 = vrot.slane %v561_v29, %v559_v20  ;;  %v579_v36 = vrot.slane %v568_v30, %v3203_v26  ;;  %v3229_v20 = vsub.s32 %v653_v13, %v3195_v19 }
  0xfc   : >> { %v583_v40 = vrot.slane %v575_v35, %v3203_v26  ;;  %v586_v41 = vadd.f32 %v2643_v31, %v579_v36  ;;  %v587_v42 = vadd.f32 %v2644_v32, %v579_v36  ;;  %v588_v47 = vadd.f32 %v2647_v43, %v579_v36 }
  0xfd   : >> { %v589_v51 = vadd.f32 %v2648_v48, %v579_v36  ;;  %v3067_v43 = vmov 0  }
  0xfe   : >> { %2979 = vtanh.f32 %v586_v41  ;;  %v590_v44 = vadd.f32 %v2651_v37, %v583_v40  ;;  %v591_v45 = vadd.f32 %v2652_v38, %v583_v40  ;;  %v592_v49 = vadd.f32 %v2655_v46, %v583_v40  ;;  %2730 = vset.pattern.permute.xlu0 %v3067_v43  ;;  %2729 = vset.pattern.permute.xlu1 %v3067_v43 }
  0xff   : >> { %2981 = vtanh.f32 %v587_v42  ;;  %v593_v52 = vadd.f32 %v2656_v50, %v583_v40  ;;  %1376 = vmatprep.mubr.bf16.mxu1 %v3067_v43  ;;  %1417 = vmatprep.mubr.bf16.mxu0 %v3067_v43  ;;  %v2750_v43 = vld [vmem:[%s3934_s7 + $0xcc] ss:$16 sps:$4 sm:$0xff]  }
 0x100   : >> { %2983 = vtanh.f32 %v590_v44  ;;  %v3254_v44 = vsub.s32 1, %v3195_v19 }
 0x101   : >> { %2985 = vtanh.f32 %v591_v45 }
 0x102   : >> { %2987 = vtanh.f32 %v588_v47 }
 0x103   : >> { %2989 = vtanh.f32 %v592_v49 }
 0x104   : >> { %2991 = vtanh.f32 %v589_v51 }
 0x105   : >> { %2993 = vtanh.f32 %v593_v52 }
 0x10b   : >> { %v2980_v53 = vpop.eup %2979 }
 0x10c   : >> { %v2982_v54 = vpop.eup %2981  ;;  %v608_v55 = vmul.f32 %v2980_v53, %v3150_v2 }
 0x10d   : >> { %v2984_v56 = vpop.eup %2983  ;;  %v609_v59 = vmul.f32 %v2982_v54, %v3150_v2 }
 0x10e   : >> { %616 = vadd.xlane.f32.xlu0 %v608_v55  ;;  %v612_v57 = vmul.f32 %v2984_v56, %v3150_v2  ;;  %v2986_v58 = vpop.eup %2985 }
 0x10f   : >> { %v2988_v60 = vpop.eup %2987  ;;  %v613_v61 = vmul.f32 %v2986_v58, %v3150_v2 }
 0x110   : >> { %624 = vadd.xlane.f32.xlu1 %v612_v57  ;;  %v2990_v62 = vpop.eup %2989  ;;  %v610_v63 = vmul.f32 %v2988_v60, %v3150_v2 }
 0x111   : >> { %v2992_v3 = vpop.eup %2991  ;;  %v614_v4 = vmul.f32 %v2990_v62, %v3150_v2 }
 0x112   : >> { %618 = vadd.xlane.f32.xlu0 %v609_v59  ;;  %v2994_v5 = vpop.eup %2993  ;;  %v611_v6 = vmul.f32 %v2992_v3, %v3150_v2 }
 0x113   : >> { %v615_v7 = vmul.f32 %v2994_v5, %v3150_v2 }
 0x114   : >> { %626 = vadd.xlane.f32.xlu1 %v613_v61 }
 0x116   : >> { %620 = vadd.xlane.f32.xlu0 %v610_v63 }
 0x118   : >> { %628 = vadd.xlane.f32.xlu1 %v614_v4 }
 0x11a   : >> { %622 = vadd.xlane.f32.xlu0 %v611_v6 }
 0x11c   : >> { %630 = vadd.xlane.f32.xlu1 %v615_v7 }
 0x197   : >> { %v617_v8 = vpop.xlane.xlu0 %616 }
 0x198   : >> { %v645_v30 = vrot.slane %v617_v8, %v3232_v22 }
 0x199   : >> { %v625_v10 = vpop.xlane.xlu1 %624 }
 0x19a   : >> { %v670_v31 = vrot.slane %v625_v10, %v3232_v22 }
 0x19b   : >> { %v619_v12 = vpop.xlane.xlu0 %618 }
 0x19c   : >> { %v650_v24 = vrot.slane %v619_v12, %v3226_v18 }
 0x19d   : >> { %v627_v16 = vpop.xlane.xlu1 %626 }
 0x19e   : >> { %v674_v25 = vrot.slane %v627_v16, %v3226_v18  ;;  %v652_v34 = vsel %vm651_vm1, %v650_v24, %v645_v30 }
 0x19f   : >> { %v621_v21 = vpop.xlane.xlu0 %620 }
 0x1a0   : >> { %v657_v27 = vrot.slane %v621_v21, %v3229_v20  ;;  %v675_v35 = vsel %vm651_vm1, %v674_v25, %v670_v31 }
 0x1a1   : >> { %v629_v17 = vpop.xlane.xlu1 %628 }
 0x1a2   : >> { %v679_v28 = vrot.slane %v629_v17, %v3229_v20  ;;  %v659_v37 = vsel %vm658_vm2, %v657_v27, %v652_v34 }
 0x1a3   : >> { %v623_v29 = vpop.xlane.xlu0 %622 }
 0x1a4   : >> { %v664_v32 = vrot.slane %v623_v29, %v3235_v23  ;;  %v680_v38 = vsel %vm658_vm2, %v679_v28, %v675_v35 }
 0x1a5   : >> { %v631_v33 = vpop.xlane.xlu1 %630 }
 0x1a6   : >> { %v684_v36 = vrot.slane %v631_v33, %v3235_v23  ;;  %v666_v39 = vsel %vm665_vm3, %v664_v32, %v659_v37 }
 0x1a8   : >> { %v685_v40 = vsel %vm665_vm3, %v684_v36, %v680_v38 }
 0x1a9   : >> { %v687_v41 = vsel %vm686_vm4, %v685_v40, %v666_v39  ;;  %v2739_v39 = vld [vmem:[%s3934_s7 + $0xe4] ss:$16 sps:$4 sm:$0xff]   ;;  %v2742_v40 = vld [vmem:[%s3934_s7 + $0xe8] ss:$16 sps:$4 sm:$0xff]  }
 0x1aa   : >> { %v690_v42 = vsel %vm689_vm5, %v687_v41, -inf  ;;  %v2744_v41 = vld [vmem:[%s3934_s7 + $0xec] ss:$16 sps:$4 sm:$0xff]   ;;  %1344 = vmatprep.subr.bf16.mxu1 %v2739_v39 }
 0x1ab   : >> { %691 = vmax.xlane.f32.xlu0 %v690_v42  ;;  %v2745_v42 = vld [vmem:[%s3934_s7 + $0xc4] ss:$16 sps:$4 sm:$0xff]   ;;  %1385 = vmatprep.subr.bf16.mxu0 %v2744_v41 }
 0x1ac   : >> { %1386 = vmatpush1.bf16.msra.mxu0 %v2742_v40  ;;  %v2813_v40 = vld [vmem:[%s3933_s6 + $0x64] ss:$16 sps:$4 sm:$0xff]  }
 0x1ad   : >> { %1387 = vmatprep.subr.bf16.mxu0 %v2750_v43  ;;  %v2816_v43 = vld [vmem:[%s3933_s6 + $0x264] ss:$16 sps:$4 sm:$0xff]  }
 0x234   : >> { %v692_v45 = vpop.xlane.xlu0 %691 }
 0x235   : >> { %v697_v46 = vrot.slane %v692_v45, %v3203_v26  ;;  %v701_v47 = vrot.slane %v692_v45, %v3254_v44  ;;  %v2747_v45 = vld [vmem:[%s3934_s7 + $0xc0] ss:$16 sps:$4 sm:$0xff]  }
 0x237   : >> { %v704_v48 = vsub.f32 %v617_v8, %v697_v46  ;;  %v705_v49 = vsub.f32 %v619_v12, %v697_v46  ;;  %v708_v50 = vsub.f32 %v625_v10, %v701_v47  ;;  %v709_v53 = vsub.f32 %v627_v16, %v701_v47 }
 0x238   : >> { %v706_v55 = vsub.f32 %v621_v21, %v697_v46  ;;  %v710_v57 = vsub.f32 %v629_v17, %v701_v47  ;;  %v707_v59 = vsub.f32 %v623_v29, %v697_v46  ;;  %v711_v63 = vsub.f32 %v631_v33, %v701_v47  ;;  %v2748_v46 = vld [vmem:[%s3934_s7 + $0xc8] ss:$16 sps:$4 sm:$0xff]   ;;  %v2751_v47 = vld [vmem:[%s3934_s7 + $0xa4] ss:$16 sps:$4 sm:$0xff]  }
 0x239   : >> { %v712_v51 = vmul.f32 1.442695, %v704_v48  ;;  %v714_v52 = vmul.f32 1.442695, %v705_v49  ;;  %v720_v54 = vmul.f32 1.442695, %v708_v50  ;;  %1388 = vmatpush1.bf16.msra.mxu0 %v2748_v46 }
 0x23a   : >> { %v722_v56 = vmul.f32 1.442695, %v709_v53  ;;  %v716_v58 = vmul.f32 1.442695, %v706_v55  ;;  %v724_v60 = vmul.f32 1.442695, %v710_v57 }
 0x23b   : >> { %2995 = vpow2.f32 %v712_v51  ;;  %v718_v3 = vmul.f32 1.442695, %v707_v59  ;;  %v726_v5 = vmul.f32 1.442695, %v711_v63  ;;  %v2756_v48 = vld [vmem:[%s3934_s7 + $0xac] ss:$16 sps:$4 sm:$0xff]  }
 0x23c   : >> { %2997 = vpow2.f32 %v714_v52  ;;  %v2753_v49 = vld [vmem:[%s3934_s7 + $0xa0] ss:$16 sps:$4 sm:$0xff]   ;;  %v2754_v50 = vld [vmem:[%s3934_s7 + $0xa8] ss:$16 sps:$4 sm:$0xff]   ;;  %v2757_v51 = vld [vmem:[%s3934_s7 + $0x84] ss:$16 sps:$4 sm:$0xff]   ;;  %1389 = vmatprep.subr.bf16.mxu0 %v2756_v48 }
 0x23d   : >> { %2999 = vpow2.f32 %v720_v54  ;;  %v2762_v52 = vld [vmem:[%s3934_s7 + $0x8c] ss:$16 sps:$4 sm:$0xff]   ;;  %v2759_v53 = vld [vmem:[%s3934_s7 + $0x80] ss:$16 sps:$4 sm:$0xff]   ;;  %1390 = vmatpush1.bf16.msra.mxu0 %v2754_v50  ;;  %v2760_v54 = vld [vmem:[%s3934_s7 + $0x88] ss:$16 sps:$4 sm:$0xff]  }
 0x23e   : >> { %3001 = vpow2.f32 %v722_v56  ;;  %v2763_v55 = vld [vmem:[%s3934_s7 + $0x64] ss:$16 sps:$4 sm:$0xff]   ;;  %1391 = vmatprep.subr.bf16.mxu0 %v2762_v52  ;;  %v2768_v56 = vld [vmem:[%s3934_s7 + $0x6c] ss:$16 sps:$4 sm:$0xff]   ;;  %v2765_v57 = vld [vmem:[%s3934_s7 + $0x60] ss:$16 sps:$4 sm:$0xff]  }
 0x23f   : >> { %3003 = vpow2.f32 %v716_v58  ;;  %v2766_v58 = vld [vmem:[%s3934_s7 + $0x68] ss:$16 sps:$4 sm:$0xff]   ;;  %v2769_v59 = vld [vmem:[%s3934_s7 + $0x44] ss:$16 sps:$4 sm:$0xff]   ;;  %v2771_v63 = vld [vmem:[%s3934_s7 + $0x40] ss:$16 sps:$4 sm:$0xff]  }
 0x240   : >> { %3005 = vpow2.f32 %v724_v60  ;;  %v2774_v60 = vld [vmem:[%s3934_s7 + $0x4c] ss:$16 sps:$4 sm:$0xff]   ;;  %v2819_v48 = vld [vmem:[%s3933_s6 + $0x44] ss:$16 sps:$4 sm:$0xff]  }
 0x241   : >> { %3007 = vpow2.f32 %v718_v3  ;;  %1392 = vmatpush1.bf16.msra.mxu0 %v2760_v54  ;;  %v2772_v3 = vld [vmem:[%s3934_s7 + $0x48] ss:$16 sps:$4 sm:$0xff]   ;;  %v2822_v50 = vld [vmem:[%s3933_s6 + $0x244] ss:$16 sps:$4 sm:$0xff]   ;;  %v2826_v54 = vld [vmem:[%s3933_s6 + $0x220] ss:$16 sps:$4 sm:$0xff]  }
 0x242   : >> { %3009 = vpow2.f32 %v726_v5  ;;  %1393 = vmatprep.subr.bf16.mxu0 %v2768_v56  ;;  %v2775_v5 = vld [vmem:[%s3934_s7 + $0x24] ss:$16 sps:$4 sm:$0xff]   ;;  %v2829_v56 = vld [vmem:[%s3933_s6] ss:$16 sps:$4 sm:$0xff]  }
 0x243   : >> { %v2828_v52 = vld [vmem:[%s3933_s6 + $0x224] ss:$16 sps:$4 sm:$0xff]  }
 0x245   : >> { %1394 = vmatpush1.bf16.msra.mxu0 %v2766_v58  ;;  %v2834_v58 = vld [vmem:[%s3933_s6 + $0x204] ss:$16 sps:$4 sm:$0xff]  }
 0x246   : >> { %1395 = vmatprep.subr.bf16.mxu0 %v2774_v60  ;;  %v2837_v60 = vld [vmem:[%s3933_s6 + $0x1e4] ss:$16 sps:$4 sm:$0xff]  }
 0x248   : >> { %v3258_v61 = vpop.eup %2995 }
 0x249   : >> { %v3260_v62 = vpop.eup %2997  ;;  %737 = vperm.xlu1 %2729, %v3258_v61   ;;  %1396 = vmatpush1.bf16.msra.mxu0 %v2772_v3  ;;  %v2840_v3 = vld [vmem:[%s3933_s6 + $0x3e4] ss:$16 sps:$4 sm:$0xff]  }
 0x24a   : >> { %740 = vperm.xlu0 %2730, %v3260_v62   ;;  %v3264_v4 = vpop.eup %2999 }
 0x24b   : >> { %v3267_v6 = vpop.eup %3001 }
 0x24c   : >> { %v3270_v7 = vpop.eup %3003 }
 0x24d   : >> { %749 = vperm.xlu1 %2729, %v3264_v4   ;;  %v3273_v8 = vpop.eup %3005 }
 0x24e   : >> { %v3276_v9 = vpop.eup %3007 }
 0x24f   : >> { %v3279_v10 = vpop.eup %3009 }
 0x251   : >> { %752 = vperm.xlu1 %2729, %v3267_v6  }
 0x255   : >> { %743 = vperm.xlu1 %2729, %v3270_v7  }
 0x259   : >> { %755 = vperm.xlu1 %2729, %v3273_v8  }
 0x25d   : >> { %746 = vperm.xlu1 %2729, %v3276_v9  }
 0x261   : >> { %758 = vperm.xlu1 %2729, %v3279_v10  }
 0x2c4   : >> { %v738_v11 = vpop.permute.xlu1 %737 }
 0x2c5   : >> { %v741_v21 = vpop.permute.xlu0 %740  ;;  %v763_v25 = vrot.slane %v738_v11, %v3232_v22  ;;  %v2780_v11 = vld [vmem:[%s3934_s7 + $0x2c] ss:$16 sps:$4 sm:$0xff]  }
 0x2c6   : >> { %v767_v24 = vrot.slane %v741_v21, %v3226_v18  ;;  %1397 = vmatprep.subr.bf16.mxu0 %v2780_v11  ;;  %v2783_v21 = vld [vmem:[%s3934_s7] ss:$16 sps:$4 sm:$0xff]   ;;  %v2846_v11 = vld [vmem:[%s3933_s6 + $0x3c4] ss:$16 sps:$4 sm:$0xff]  }
 0x2c8   : >> { %v750_v12 = vpop.permute.xlu1 %749  ;;  %v768_v33 = vsel %vm651_vm1, %v767_v24, %v763_v25  ;;  %v2789_v24 = vld [vmem:[%s3933_s6 + $0xe4] ss:$16 sps:$4 sm:$0xff]  }
 0x2c9   : >> { %v782_v30 = vrot.slane %v750_v12, %v3232_v22  ;;  %v2777_v12 = vld [vmem:[%s3934_s7 + $0x20] ss:$16 sps:$4 sm:$0xff]   ;;  %v2792_v25 = vld [vmem:[%s3933_s6 + $0x2e4] ss:$16 sps:$4 sm:$0xff]  }
 0x2cc   : >> { %v753_v13 = vpop.permute.xlu1 %752 }
 0x2cd   : >> { %v786_v27 = vrot.slane %v753_v13, %v3226_v18  ;;  %v2778_v13 = vld [vmem:[%s3934_s7 + $0x28] ss:$16 sps:$4 sm:$0xff]  }
 0x2ce   : >> { %1398 = vmatpush1.bf16.msra.mxu0 %v2778_v13  ;;  %v2844_v13 = vld [vmem:[%s3933_s6 + $0x3c0] ss:$16 sps:$4 sm:$0xff]  }
 0x2cf   : >> { %v787_v34 = vsel %vm651_vm1, %v786_v27, %v782_v30  ;;  %v2787_v27 = vld [vmem:[%s3933_s6 + $0xe0] ss:$16 sps:$4 sm:$0xff]   ;;  %v2798_v30 = vld [vmem:[%s3933_s6 + $0x2c4] ss:$16 sps:$4 sm:$0xff]  }
 0x2d0   : >> { %v744_v15 = vpop.permute.xlu1 %743 }
 0x2d1   : >> { %v772_v28 = vrot.slane %v744_v15, %v3229_v20  ;;  %v2781_v15 = vld [vmem:[%s3934_s7 + $0x4] ss:$16 sps:$4 sm:$0xff]  }
 0x2d3   : >> { %v773_v36 = vsel %vm658_vm2, %v772_v28, %v768_v33  ;;  %v2790_v28 = vld [vmem:[%s3933_s6 + $0x2e0] ss:$16 sps:$4 sm:$0xff]   ;;  %v2801_v33 = vld [vmem:[%s3933_s6 + $0xa4] ss:$16 sps:$4 sm:$0xff]  }
 0x2d4   : >> { %v756_v16 = vpop.permute.xlu1 %755 }
 0x2d5   : >> { %v791_v29 = vrot.slane %v756_v16, %v3229_v20  ;;  %v2786_v16 = vld [vmem:[%s3934_s7 + $0xc] ss:$16 sps:$4 sm:$0xff]  }
 0x2d6   : >> { %1399 = vmatprep.subr.bf16.mxu0 %v2786_v16 }
 0x2d7   : >> { %v792_v37 = vsel %vm658_vm2, %v791_v29, %v787_v34  ;;  %v2795_v29 = vld [vmem:[%s3933_s6 + $0xc4] ss:$16 sps:$4 sm:$0xff]   ;;  %v2799_v34 = vld [vmem:[%s3933_s6 + $0xa0] ss:$16 sps:$4 sm:$0xff]  }
 0x2d8   : >> { %v747_v17 = vpop.permute.xlu1 %746 }
 0x2d9   : >> { %v777_v31 = vrot.slane %v747_v17, %v3235_v23  ;;  %v2784_v17 = vld [vmem:[%s3934_s7 + $0x8] ss:$16 sps:$4 sm:$0xff]  }
 0x2da   : >> { %1400 = vmatpush1.bf16.msra.mxu0 %v2784_v17  ;;  %v2847_v17 = vld [vmem:[%s3933_s6 + $0x1a0] ss:$16 sps:$4 sm:$0xff]  }
 0x2db   : >> { %v778_v18 = vsel %vm665_vm3, %v777_v31, %v773_v36  ;;  %2135 = vmatprep.subr.bf16.mxu0 %v2792_v25  ;;  %v2793_v31 = vld [vmem:[%s3933_s6 + $0xc0] ss:$16 sps:$4 sm:$0xff]   ;;  %v2807_v36 = vld [vmem:[%s3933_s6 + $0x84] ss:$16 sps:$4 sm:$0xff]  }
 0x2dc   : >> { %v759_v32 = vpop.permute.xlu1 %758  ;;  %v2853_v25 = vld [vmem:[%s3933_s6 + $0x180] ss:$16 sps:$4 sm:$0xff]  }
 0x2dd   : >> { %v796_v35 = vrot.slane %v759_v32, %v3235_v23  ;;  %v2741_v23 = vld [vmem:[%s3934_s7 + $0xe0] ss:$16 sps:$4 sm:$0xff]   ;;  %1418 = vmatmul.mubr.bf16.vlgmr.msra.gmra.mxu0 %v3191_v14 }
 0x2de   : >> { %1345 = vmatpush1.bf16.msra.mxu1 %v2741_v23  ;;  %2136 = vmatpush1.bf16.msra.mxu0 %v2790_v28  ;;  %v2796_v32 = vld [vmem:[%s3933_s6 + $0x2c0] ss:$16 sps:$4 sm:$0xff]   ;;  %v2861_v28 = vld [vmem:[%s3933_s6 + $0x164] ss:$16 sps:$4 sm:$0xff]  }
 0x2df   : >> { %v797_v38 = vsel %vm665_vm3, %v796_v35, %v792_v37  ;;  %1346 = vmatprep.subr.bf16.mxu1 %v2745_v42  ;;  %2137 = vmatprep.subr.bf16.mxu0 %v2798_v30  ;;  %v2802_v35 = vld [vmem:[%s3933_s6 + $0x2a0] ss:$16 sps:$4 sm:$0xff]   ;;  %v2810_v37 = vld [vmem:[%s3933_s6 + $0x284] ss:$16 sps:$4 sm:$0xff]  }
 0x2e0   : >> { %v798_v20 = vsel %vm686_vm4, %v797_v38, %v778_v18  ;;  %v2805_v18 = vld [vmem:[%s3933_s6 + $0x80] ss:$16 sps:$4 sm:$0xff]  }
 0x2e1   : >> { %v800_v22 = vsel %vm689_vm5, %v798_v20, 0.0  ;;  %v2808_v38 = vld [vmem:[%s3933_s6 + $0x280] ss:$16 sps:$4 sm:$0xff]  }
 0x2e2   : >> { %801 = vadd.xlane.f32.xlu1 %v800_v22  ;;  %1347 = vmatpush1.bf16.msra.mxu1 %v2747_v45  ;;  %v2811_v23 = vld [vmem:[%s3933_s6 + $0x60] ss:$16 sps:$4 sm:$0xff]  }
 0x2e3   : >> { %1348 = vmatprep.subr.bf16.mxu1 %v2751_v47  ;;  %2138 = vmatpush1.bf16.msra.mxu0 %v2796_v32  ;;  %v2814_v42 = vld [vmem:[%s3933_s6 + $0x260] ss:$16 sps:$4 sm:$0xff]   ;;  %v2867_v32 = vld [vmem:[%s3933_s6 + $0x144] ss:$16 sps:$4 sm:$0xff]  }
 0x2e4   : >> { %v2817_v47 = vld [vmem:[%s3933_s6 + $0x40] ss:$16 sps:$4 sm:$0xff]  }
 0x2e5   : >> { %v2859_v30 = vld [vmem:[%s3933_s6 + $0x160] ss:$16 sps:$4 sm:$0xff]  }
 0x2e6   : >> { %1349 = vmatpush1.bf16.msra.mxu1 %v2753_v49  ;;  %v2820_v49 = vld [vmem:[%s3933_s6 + $0x240] ss:$16 sps:$4 sm:$0xff]  }
 0x2e7   : >> { %1350 = vmatprep.subr.bf16.mxu1 %v2757_v51  ;;  %v2823_v51 = vld [vmem:[%s3933_s6 + $0x20] ss:$16 sps:$4 sm:$0xff]  }
 0x2ea   : >> { %1351 = vmatpush1.bf16.msra.mxu1 %v2759_v53 }
 0x2eb   : >> { %1352 = vmatprep.subr.bf16.mxu1 %v2763_v55 }
 0x2ee   : >> { %1353 = vmatpush1.bf16.msra.mxu1 %v2765_v57  ;;  %v2832_v57 = vld [vmem:[%s3933_s6 + $0x200] ss:$16 sps:$4 sm:$0xff]  }
 0x2ef   : >> { %1354 = vmatprep.subr.bf16.mxu1 %v2769_v59  ;;  %v2835_v59 = vld [vmem:[%s3933_s6 + $0x1e0] ss:$16 sps:$4 sm:$0xff]  }
 0x2f2   : >> { %1355 = vmatpush1.bf16.msra.mxu1 %v2771_v63  ;;  %v2838_v63 = vld [vmem:[%s3933_s6 + $0x3e0] ss:$16 sps:$4 sm:$0xff]  }
 0x2f3   : >> { %1356 = vmatprep.subr.bf16.mxu1 %v2775_v5  ;;  %v2841_v5 = vld [vmem:[%s3933_s6 + $0x1c0] ss:$16 sps:$4 sm:$0xff]  }
 0x2f6   : >> { %1357 = vmatpush1.bf16.msra.mxu1 %v2777_v12 }
 0x2f7   : >> { %1358 = vmatprep.subr.bf16.mxu1 %v2781_v15 }
 0x2fa   : >> { %1359 = vmatpush1.bf16.msra.mxu1 %v2783_v21  ;;  %v2852_v21 = vld [vmem:[%s3933_s6 + $0x3a4] ss:$16 sps:$4 sm:$0xff]  }
 0x2fb   : >> { %2094 = vmatprep.subr.bf16.mxu1 %v2789_v24  ;;  %v2858_v24 = vld [vmem:[%s3933_s6 + $0x384] ss:$16 sps:$4 sm:$0xff]  }
 0x2fd   : >> { %1377 = vmatmul.mubr.bf16.vlgmr.msra.gmra.mxu1 %v3191_v14  ;;  %v2804_v14 = vld [vmem:[%s3933_s6 + $0x2a4] ss:$16 sps:$4 sm:$0xff]  }
 0x2fe   : >> { %2095 = vmatpush1.bf16.msra.mxu1 %v2787_v27  ;;  %2139 = vmatprep.subr.bf16.mxu0 %v2804_v14  ;;  %v2856_v27 = vld [vmem:[%s3933_s6 + $0x380] ss:$16 sps:$4 sm:$0xff]  }
 0x2ff   : >> { %2096 = vmatprep.subr.bf16.mxu1 %v2795_v29  ;;  %2140 = vmatpush1.bf16.msra.mxu0 %v2802_v35  ;;  %v2864_v29 = vld [vmem:[%s3933_s6 + $0x364] ss:$16 sps:$4 sm:$0xff]   ;;  %v2865_v14 = vld [vmem:[%s3933_s6 + $0x140] ss:$16 sps:$4 sm:$0xff]  }
 0x300   : >> { %2141 = vmatprep.subr.bf16.mxu0 %v2810_v37  ;;  %v2873_v35 = vld [vmem:[%s3933_s6 + $0x124] ss:$16 sps:$4 sm:$0xff]   ;;  %v2871_v37 = vld [vmem:[%s3933_s6 + $0x120] ss:$16 sps:$4 sm:$0xff]  }
 0x302   : >> { %2097 = vmatpush1.bf16.msra.mxu1 %v2793_v31  ;;  %v2862_v31 = vld [vmem:[%s3933_s6 + $0x360] ss:$16 sps:$4 sm:$0xff]  }
 0x303   : >> { %2098 = vmatprep.subr.bf16.mxu1 %v2801_v33  ;;  %2142 = vmatpush1.bf16.msra.mxu0 %v2808_v38  ;;  %v2870_v33 = vld [vmem:[%s3933_s6 + $0x344] ss:$16 sps:$4 sm:$0xff]  }
 0x304   : >> { %2143 = vmatprep.subr.bf16.mxu0 %v2816_v43  ;;  %v2879_v38 = vld [vmem:[%s3933_s6 + $0x104] ss:$16 sps:$4 sm:$0xff]  }
 0x306   : >> { %2099 = vmatpush1.bf16.msra.mxu1 %v2799_v34  ;;  %v2868_v34 = vld [vmem:[%s3933_s6 + $0x340] ss:$16 sps:$4 sm:$0xff]  }
 0x307   : >> { %2100 = vmatprep.subr.bf16.mxu1 %v2807_v36  ;;  %2144 = vmatpush1.bf16.msra.mxu0 %v2814_v42  ;;  %v2876_v36 = vld [vmem:[%s3933_s6 + $0x324] ss:$16 sps:$4 sm:$0xff]  }
 0x308   : >> { %2145 = vmatprep.subr.bf16.mxu0 %v2822_v50  ;;  %v827_v50 = vld [vmem:[%s3927_s0 + $0x18] sm:$0xff] }
 0x30a   : >> { %2101 = vmatpush1.bf16.msra.mxu1 %v2805_v18  ;;  %v2874_v18 = vld [vmem:[%s3933_s6 + $0x320] ss:$16 sps:$4 sm:$0xff]  }
 0x30b   : >> { %2102 = vmatprep.subr.bf16.mxu1 %v2813_v40  ;;  %2146 = vmatpush1.bf16.msra.mxu0 %v2820_v49  ;;  %v2888_v40 = vld [vmem:[%s3933_s6 + $0x2ec] ss:$16 sps:$4 sm:$0xff]  }
 0x30c   : >> { %2147 = vmatprep.subr.bf16.mxu0 %v2828_v52  ;;  %v3636_v52 = vld [vmem:[%s3927_s0 + $0x48] sm:$0xff] }
 0x30e   : >> { %2103 = vmatpush1.bf16.msra.mxu1 %v2811_v23  ;;  %v2885_v23 = vld [vmem:[%s3933_s6 + $0xec] ss:$16 sps:$4 sm:$0xff]  }
 0x30f   : >> { %2104 = vmatprep.subr.bf16.mxu1 %v2819_v48  ;;  %2148 = vmatpush1.bf16.msra.mxu0 %v2826_v54  ;;  %v3618_v48 = vld [vmem:[%s3927_s0 + $0x8] sm:$0xff] }
 0x310   : >> { %2149 = vmatprep.subr.bf16.mxu0 %v2834_v58  ;;  %v3645_v58 = vld [vmem:[%s3927_s0 + $0x50] sm:$0xff] }
 0x312   : >> { %2105 = vmatpush1.bf16.msra.mxu1 %v2817_v47  ;;  %v824_v47 = vld [vmem:[%s3927_s0] sm:$0xff] }
 0x313   : >> { %2150 = vmatpush1.bf16.msra.mxu0 %v2832_v57  ;;  %v843_v57 = vunpack.c.h.bf16 %v3618_v48 }
 0x314   : >> { %2151 = vmatprep.subr.bf16.mxu0 %v2840_v3  ;;  %v846_v3 = vunpack.c.l.bf16 %v827_v50 }
 0x317   : >> { %2152 = vmatpush2.bf16.msra.mxu0 %v2838_v63 }
 0x318   : >> { %2153 = vmatprep.subr.bf16.mxu0 %v2846_v11  ;;  %v829_v11 = vld [vmem:[%s3927_s0 + $0x28] sm:$0xff] }
 0x31b   : >> { %2154 = vmatpush2.bf16.msra.mxu0 %v2844_v13 }
 0x31c   : >> { %2155 = vmatprep.subr.bf16.mxu0 %v2852_v21  ;;  %v836_v21 = vld [vmem:[%s3927_s0 + $0x60] sm:$0xff] }
 0x36b   : >> { %v802_v20 = vpop.xlane.xlu1 %801 }
 0x36c   : >> { %v807_v22 = vrot.slane %v802_v20, %v3203_v26  ;;  %v811_v39 = vrot.slane %v802_v20, %v3254_v44  ;;  %v2882_v20 = vld [vmem:[%s3933_s6 + $0x304] ss:$16 sps:$4 sm:$0xff]  }
 0x36e   : >> { %3011 = vrcp.f32 %v807_v22  ;;  %v2877_v22 = vld [vmem:[%s3933_s6 + $0x100] ss:$16 sps:$4 sm:$0xff]  }
 0x36f   : >> { %3013 = vrcp.f32 %v811_v39  ;;  %v2880_v39 = vld [vmem:[%s3933_s6 + $0x300] ss:$16 sps:$4 sm:$0xff]  }
 0x37b   : >> { %v3012_v41 = vpop.eup %3011 }
 0x37c   : >> { %v815_v45 = vmul.f32 %v3012_v41, %v3258_v61  ;;  %v816_v46 = vmul.f32 %v3012_v41, %v3260_v62  ;;  %v3014_v61 = vpop.eup %3013  ;;  %v2825_v62 = vld [vmem:[%s3933_s6 + $0x24] ss:$16 sps:$4 sm:$0xff]   ;;  %v818_v15 = vmul.f32 %v3012_v41, %v3276_v9  ;;  %v2850_v9 = vld [vmem:[%s3933_s6 + $0x3a0] ss:$16 sps:$4 sm:$0xff]  }
 0x37d   : >> { %v820_v53 = vmul.f32 %v3014_v61, %v3264_v4  ;;  %2106 = vmatprep.subr.bf16.mxu1 %v2825_v62  ;;  %v821_v55 = vmul.f32 %v3014_v61, %v3267_v6  ;;  %v2831_v4 = vld [vmem:[%s3933_s6 + $0x4] ss:$16 sps:$4 sm:$0xff]   ;;  %v817_v6 = vmul.f32 %v3012_v41, %v3270_v7  ;;  %v822_v12 = vmul.f32 %v3014_v61, %v3273_v8 }
 0x37e   : >> { %874 = vperm.xlu0 %2730, %v815_v45   ;;  %2107 = vmatpush1.bf16.msra.mxu1 %v2823_v51  ;;  %v2843_v7 = vld [vmem:[%s3933_s6 + $0x1c4] ss:$16 sps:$4 sm:$0xff]   ;;  %v823_v16 = vmul.f32 %v3014_v61, %v3279_v10 }
 0x37f   : >> { %2108 = vmatprep.subr.bf16.mxu1 %v2831_v4  ;;  %v2849_v8 = vld [vmem:[%s3933_s6 + $0x1a4] ss:$16 sps:$4 sm:$0xff]   ;;  %2156 = vmatpush2.bf16.msra.mxu0 %v2850_v9  ;;  %v842_v4 = vunpack.c.l.bf16 %v3618_v48  ;;  %v860_v9 = vunpack.c.l.bf16 %v3645_v58 }
 0x380   : >> { %v2855_v10 = vld [vmem:[%s3933_s6 + $0x184] ss:$16 sps:$4 sm:$0xff]   ;;  %2157 = vmatprep.subr.bf16.mxu0 %v2858_v24 }
 0x381   : >> { %v826_v61 = vld [vmem:[%s3927_s0 + $0x10] sm:$0xff]  ;;  %v3631_v51 = vld [vmem:[%s3927_s0 + $0x40] sm:$0xff] }
 0x382   : >> { %879 = vperm.xlu0 %2730, %v816_v46   ;;  %2109 = vmatpush1.bf16.msra.mxu1 %v2829_v56  ;;  %v841_v56 = vunpack.c.h.bf16 %v824_v47  ;;  %v845_v63 = vunpack.c.h.bf16 %v826_v61  ;;  %v856_v13 = vunpack.c.l.bf16 %v3631_v51 }
 0x383   : >> { %2110 = vmatprep.subr.bf16.mxu1 %v2837_v60  ;;  %2158 = vmatpush2.bf16.msra.mxu0 %v2856_v27  ;;  %v844_v60 = vunpack.c.l.bf16 %v826_v61 }
 0x384   : >> { %2159 = vmatprep.subr.bf16.mxu0 %v2864_v29  ;;  %v831_v29 = vld [vmem:[%s3927_s0 + $0x38] sm:$0xff] }
 0x386   : >> { %894 = vperm.xlu0 %2730, %v820_v53   ;;  %2111 = vmatpush2.bf16.msra.mxu1 %v2835_v59 }
 0x387   : >> { %2112 = vmatprep.subr.bf16.mxu1 %v2843_v7  ;;  %2160 = vmatpush2.bf16.msra.mxu0 %v2862_v31  ;;  %v847_v7 = vunpack.c.h.bf16 %v827_v50 }
 0x388   : >> { %2161 = vmatprep.subr.bf16.mxu0 %v2870_v33  ;;  %v851_v33 = vunpack.c.h.bf16 %v829_v11 }
 0x38a   : >> { %899 = vperm.xlu0 %2730, %v821_v55   ;;  %2113 = vmatpush2.bf16.msra.mxu1 %v2841_v5  ;;  %v840_v55 = vunpack.c.l.bf16 %v824_v47  ;;  %v828_v5 = vld [vmem:[%s3927_s0 + $0x20] sm:$0xff] }
 0x38b   : >> { %2114 = vmatprep.subr.bf16.mxu1 %v2849_v8  ;;  %2162 = vmatpush2.bf16.msra.mxu0 %v2868_v34  ;;  %v859_v8 = vunpack.c.h.bf16 %v3636_v52  ;;  %v849_v31 = vunpack.c.h.bf16 %v828_v5  ;;  %v865_v34 = vunpack.c.h.bf16 %v836_v21 }
 0x38c   : >> { %2163 = vmatprep.subr.bf16.mxu0 %v2876_v36 }
 0x38e   : >> { %884 = vperm.xlu0 %2730, %v817_v6   ;;  %2115 = vmatpush2.bf16.msra.mxu1 %v2847_v17  ;;  %v3650_v6 = vld [vmem:[%s3927_s0 + $0x58] sm:$0xff]  ;;  %v837_v17 = vld [vmem:[%s3927_s0 + $0x68] sm:$0xff] }
 0x38f   : >> { %2116 = vmatprep.subr.bf16.mxu1 %v2855_v10  ;;  %2164 = vmatpush2.bf16.msra.mxu0 %v2874_v18  ;;  %v861_v10 = vunpack.c.h.bf16 %v3645_v58  ;;  %v862_v24 = vunpack.c.l.bf16 %v3650_v6  ;;  %v867_v36 = vunpack.c.h.bf16 %v837_v17  ;;  %v3686_v18 = vld [vmem:[%s3927_s0 + $0x78] sm:$0xff] }
 0x390   : >> { %2165 = vmatprep.subr.bf16.mxu0 %v2882_v20 }
 0x392   : >> { %904 = vperm.xlu0 %2730, %v822_v12   ;;  %2117 = vmatpush2.bf16.msra.mxu1 %v2853_v25  ;;  %v863_v25 = vunpack.c.h.bf16 %v3650_v6 }
 0x393   : >> { %2118 = vmatprep.subr.bf16.mxu1 %v2861_v28  ;;  %2166 = vmatpush2.bf16.msra.mxu0 %v2880_v39  ;;  %v830_v28 = vld [vmem:[%s3927_s0 + $0x30] sm:$0xff]  ;;  %v855_v39 = vunpack.c.h.bf16 %v831_v29 }
 0x394   : >> { %2217 = vmatprep.subr.bf16.mxu0 %v2888_v40  ;;  %v853_v20 = vunpack.c.h.bf16 %v830_v28 }
 0x396   : >> { %889 = vperm.xlu0 %2730, %v818_v15   ;;  %2119 = vmatpush2.bf16.msra.mxu1 %v2859_v30  ;;  %v857_v15 = vunpack.c.h.bf16 %v3631_v51  ;;  %v848_v30 = vunpack.c.l.bf16 %v828_v5  ;;  %v870_v51 = vunpack.c.l.bf16 %v3686_v18 }
 0x397   : >> { %2120 = vmatprep.subr.bf16.mxu1 %v2867_v32  ;;  %v850_v32 = vunpack.c.l.bf16 %v829_v11 }
 0x39a   : >> { %909 = vperm.xlu0 %2730, %v823_v16   ;;  %2121 = vmatpush2.bf16.msra.mxu1 %v2865_v14  ;;  %v858_v16 = vunpack.c.l.bf16 %v3636_v52  ;;  %v864_v14 = vunpack.c.l.bf16 %v836_v21  ;;  %v871_v52 = vunpack.c.h.bf16 %v3686_v18 }
 0x39b   : >> { %2122 = vmatprep.subr.bf16.mxu1 %v2873_v35  ;;  %v866_v35 = vunpack.c.l.bf16 %v837_v17 }
 0x39d   : >> { %v3608_v45 = vpop.f32.mrf.mxu0 }
 0x39e   : >> { %2123 = vmatpush2.bf16.msra.mxu1 %v2871_v37  ;;  %v3681_v37 = vld [vmem:[%s3927_s0 + $0x70] sm:$0xff] }
 0x39f   : >> { %2124 = vmatprep.subr.bf16.mxu1 %v2879_v38  ;;  %v3620_v49 = vpop.f32.mrf.mxu0  ;;  %v852_v38 = vunpack.c.l.bf16 %v830_v28  ;;  %v868_v50 = vunpack.c.l.bf16 %v3681_v37 }
 0x3a1   : >> { %v1423_v54 = vpop.f32.mrf.mxu0 }
 0x3a2   : >> { %2125 = vmatpush2.bf16.msra.mxu1 %v2877_v22  ;;  %v854_v22 = vunpack.c.l.bf16 %v831_v29 }
 0x3a3   : >> { %2176 = vmatprep.subr.bf16.mxu1 %v2885_v23  ;;  %v1424_v12 = vpop.f32.mrf.mxu0 }
 0x3bd   : >> { %v3606_v42 = vpop.f32.mrf.mxu1 }
 0x3bf   : >> { %v3610_v46 = vpop.f32.mrf.mxu1 }
 0x3c1   : >> { %v1382_v62 = vpop.f32.mrf.mxu1 }
 0x3c2   : >> { %v869_v62 = vunpack.c.h.bf16 %v3681_v37 }
 0x3c3   : >> { %v1383_v59 = vpop.f32.mrf.mxu1 }
 0x3f9   : >> { %v3604_v41 = vpop.permute.xlu0 %874 }
 0x3fa   : >> { %v912_v54 = vmul.f32 %v3604_v41, %v840_v55  ;;  %v913_v58 = vmul.f32 %v3604_v41, %v841_v56  ;;  %v914_v6 = vmul.f32 %v3604_v41, %v842_v4  ;;  %v915_v59 = vmul.f32 %v3604_v41, %v843_v57 }
 0x3fd   : >> { %v880_v43 = vpop.permute.xlu0 %879 }
 0x3fe   : >> { %v916_v23 = vmul.f32 %v880_v43, %v844_v60  ;;  %v917_v40 = vmul.f32 %v880_v43, %v845_v63  ;;  %v918_v47 = vmul.f32 %v880_v43, %v846_v3  ;;  %v919_v48 = vmul.f32 %v880_v43, %v847_v7 }
 0x400   : >> { %v944_v7 = vadd.f32 %v916_v23, %v912_v54  ;;  %v953_v5 = vadd.f32 %v917_v40, %v913_v58  ;;  %v962_v11 = vadd.f32 %v918_v47, %v914_v6  ;;  %v971_v12 = vadd.f32 %v919_v48, %v915_v59 }
 0x401   : >> { %v3638_v53 = vpop.permute.xlu0 %894 }
 0x402   : >> { %v928_v17 = vmul.f32 %v3638_v53, %v856_v13  ;;  %v929_v28 = vmul.f32 %v3638_v53, %v857_v15  ;;  %v930_v55 = vmul.f32 %v3638_v53, %v858_v16  ;;  %v931_v56 = vmul.f32 %v3638_v53, %v859_v8 }
 0x405   : >> { %v900_v27 = vpop.permute.xlu0 %899 }
 0x406   : >> { %v932_v4 = vmul.f32 %v900_v27, %v860_v9  ;;  %v933_v29 = vmul.f32 %v900_v27, %v861_v10  ;;  %v934_v41 = vmul.f32 %v900_v27, %v862_v24  ;;  %v935_v57 = vmul.f32 %v900_v27, %v863_v25 }
 0x408   : >> { %v980_v16 = vadd.f32 %v932_v4, %v928_v17  ;;  %v989_v54 = vadd.f32 %v933_v29, %v929_v28  ;;  %v998_v53 = vadd.f32 %v934_v41, %v930_v55  ;;  %v1007_v8 = vadd.f32 %v935_v57, %v931_v56 }
 0x409   : >> { %v885_v61 = vpop.permute.xlu0 %884 }
 0x40a   : >> { %v920_v60 = vmul.f32 %v885_v61, %v848_v30  ;;  %v921_v63 = vmul.f32 %v885_v61, %v849_v31  ;;  %v922_v43 = vmul.f32 %v885_v61, %v850_v32  ;;  %v923_v3 = vmul.f32 %v885_v61, %v851_v33 }
 0x40c   : >> { %v945_v30 = vadd.f32 %v944_v7, %v920_v60  ;;  %v954_v31 = vadd.f32 %v953_v5, %v921_v63  ;;  %v963_v32 = vadd.f32 %v962_v11, %v922_v43  ;;  %v972_v33 = vadd.f32 %v971_v12, %v923_v3 }
 0x40d   : >> { %v905_v21 = vpop.permute.xlu0 %904 }
 0x40e   : >> { %v936_v37 = vmul.f32 %v905_v21, %v864_v14  ;;  %v937_v18 = vmul.f32 %v905_v21, %v865_v34  ;;  %v938_v23 = vmul.f32 %v905_v21, %v866_v35  ;;  %v939_v40 = vmul.f32 %v905_v21, %v867_v36 }
 0x410   : >> { %v981_v27 = vadd.f32 %v980_v16, %v936_v37  ;;  %v990_v58 = vadd.f32 %v989_v54, %v937_v18  ;;  %v999_v6 = vadd.f32 %v998_v53, %v938_v23  ;;  %v1008_v14 = vadd.f32 %v1007_v8, %v939_v40 }
 0x411   : >> { %v890_v47 = vpop.permute.xlu0 %889 }
 0x412   : >> { %v924_v13 = vmul.f32 %v890_v47, %v852_v38  ;;  %v925_v48 = vmul.f32 %v890_v47, %v853_v20  ;;  %v926_v15 = vmul.f32 %v890_v47, %v854_v22  ;;  %v927_v61 = vmul.f32 %v890_v47, %v855_v39 }
 0x414   : >> { %v946_v9 = vadd.f32 %v945_v30, %v924_v13  ;;  %v955_v10 = vadd.f32 %v954_v31, %v925_v48  ;;  %v964_v24 = vadd.f32 %v963_v32, %v926_v15  ;;  %v973_v25 = vadd.f32 %v972_v33, %v927_v61 }
 0x415   : >> { %v910_v34 = vpop.permute.xlu0 %909 }
 0x416   : >> { %v947_v35 = vrot.slane %v946_v9, 4  ;;  %v956_v36 = vrot.slane %v955_v10, 4  ;;  %v965_v59 = vrot.slane %v964_v24, 4  ;;  %v974_v38 = vrot.slane %v973_v25, 4 }
 0x417   : >> { %v940_v20 = vmul.f32 %v910_v34, %v868_v50  ;;  %v941_v22 = vmul.f32 %v910_v34, %v869_v62  ;;  %v942_v39 = vmul.f32 %v910_v34, %v870_v51  ;;  %v943_v60 = vmul.f32 %v910_v34, %v871_v52 }
 0x418   : >> { %v948_v63 = vadd.f32 %v947_v35, %v946_v9  ;;  %v957_v43 = vadd.f32 %v956_v36, %v955_v10  ;;  %v966_v3 = vadd.f32 %v965_v59, %v964_v24  ;;  %v975_v7 = vadd.f32 %v974_v38, %v973_v25 }
 0x419   : >> { %v982_v5 = vadd.f32 %v981_v27, %v940_v20  ;;  %v991_v11 = vadd.f32 %v990_v58, %v941_v22  ;;  %v1000_v12 = vadd.f32 %v999_v6, %v942_v39  ;;  %v1009_v21 = vadd.f32 %v1008_v14, %v943_v60 }
 0x41a   : >> { %v949_v17 = vrot.slane %v948_v63, 2  ;;  %v958_v28 = vrot.slane %v957_v43, 2  ;;  %v967_v55 = vrot.slane %v966_v3, 2  ;;  %v976_v56 = vrot.slane %v975_v7, 2 }
 0x41b   : >> { %v983_v4 = vrot.slane %v982_v5, 4  ;;  %v992_v29 = vrot.slane %v991_v11, 4  ;;  %v1001_v41 = vrot.slane %v1000_v12, 4  ;;  %v1010_v57 = vrot.slane %v1009_v21, 4 }
 0x41c   : >> { %v950_v50 = vadd.f32 %v949_v17, %v948_v63  ;;  %v968_v62 = vadd.f32 %v967_v55, %v966_v3  ;;  %v959_v51 = vadd.f32 %v958_v28, %v957_v43  ;;  %v977_v52 = vadd.f32 %v976_v56, %v975_v7 }
 0x41d   : >> { %v984_v30 = vadd.f32 %v983_v4, %v982_v5  ;;  %v993_v31 = vadd.f32 %v992_v29, %v991_v11  ;;  %v1002_v32 = vadd.f32 %v1001_v41, %v1000_v12  ;;  %v1011_v33 = vadd.f32 %v1010_v57, %v1009_v21 }
 0x41e   : >> { %v951_v37 = vrot.slane %v950_v50, 1  ;;  %v969_v18 = vrot.slane %v968_v62, 1  ;;  %v960_v23 = vrot.slane %v959_v51, 1  ;;  %v978_v40 = vrot.slane %v977_v52, 1 }
 0x41f   : >> { %v985_v47 = vrot.slane %v984_v30, 2  ;;  %v994_v13 = vrot.slane %v993_v31, 2  ;;  %v1003_v48 = vrot.slane %v1002_v32, 2  ;;  %v1012_v15 = vrot.slane %v1011_v33, 2 }
 0x420   : >> { %v961_v61 = vadd.f32 %v960_v23, %v959_v51  ;;  %v979_v16 = vadd.f32 %v978_v40, %v977_v52  ;;  %v952_v54 = vadd.f32 %v951_v37, %v950_v50  ;;  %v970_v53 = vadd.f32 %v969_v18, %v968_v62  ;;  %v2883_v50 = vld [vmem:[%s3933_s6 + $0xe8] ss:$16 sps:$4 sm:$0xff]   ;;  %v2897_v37 = vld [vmem:[%s3933_s6 + $0xac] ss:$16 sps:$4 sm:$0xff]  }
 0x421   : >> { %v986_v8 = vadd.f32 %v985_v47, %v984_v30  ;;  %v995_v9 = vadd.f32 %v994_v13, %v993_v31  ;;  %v1004_v10 = vadd.f32 %v1003_v48, %v1002_v32  ;;  %v1013_v24 = vadd.f32 %v1012_v15, %v1011_v33  ;;  %v2886_v62 = vld [vmem:[%s3933_s6 + $0x2e8] ss:$16 sps:$4 sm:$0xff]   ;;  %v2891_v30 = vld [vmem:[%s3933_s6 + $0xcc] ss:$16 sps:$4 sm:$0xff]  }
 0x422   : >> { %v1017_v14 = vpack.c.bf16 %v961_v61, %v961_v61  ;;  %v1019_v34 = vpack.c.bf16 %v979_v16, %v979_v16  ;;  %v1016_v35 = vpack.c.bf16 %v952_v54, %v952_v54  ;;  %v1018_v36 = vpack.c.bf16 %v970_v53, %v970_v53  ;;  %v2894_v31 = vld [vmem:[%s3933_s6 + $0x2cc] ss:$16 sps:$4 sm:$0xff]   ;;  %v2889_v32 = vld [vmem:[%s3933_s6 + $0xc8] ss:$16 sps:$4 sm:$0xff]  }
 0x423   : >> { %v987_v25 = vrot.slane %v986_v8, 1  ;;  %v996_v27 = vrot.slane %v995_v9, 1  ;;  %v1005_v58 = vrot.slane %v1004_v10, 1  ;;  %v1014_v6 = vrot.slane %v1013_v24, 1  ;;  %v2892_v33 = vld [vmem:[%s3933_s6 + $0x2c8] ss:$16 sps:$4 sm:$0xff]  }
 0x424   : >> { %v1435_v3 = vunpack.c.l.b16 %v1017_v14  ;;  %v1437_v7 = vunpack.c.l.b16 %v1019_v34  ;;  %v1434_v5 = vunpack.c.l.b16 %v1016_v35  ;;  %v1436_v11 = vunpack.c.l.b16 %v1018_v36  ;;  %v2900_v18 = vld [vmem:[%s3933_s6 + $0x2ac] ss:$16 sps:$4 sm:$0xff]   ;;  %v2895_v23 = vld [vmem:[%s3933_s6 + $0xa8] ss:$16 sps:$4 sm:$0xff]  }
 0x425   : >> { %v988_v59 = vadd.f32 %v987_v25, %v986_v8  ;;  %v1006_v38 = vadd.f32 %v1005_v58, %v1004_v10  ;;  %v997_v20 = vadd.f32 %v996_v27, %v995_v9  ;;  %v1015_v22 = vadd.f32 %v1014_v6, %v1013_v24  ;;  %v2898_v40 = vld [vmem:[%s3933_s6 + $0x2a8] ss:$16 sps:$4 sm:$0xff]   ;;  %v2903_v47 = vld [vmem:[%s3933_s6 + $0x8c] ss:$16 sps:$4 sm:$0xff]  }
 0x426   : >> { %v2906_v13 = vld [vmem:[%s3933_s6 + $0x28c] ss:$16 sps:$4 sm:$0xff]   ;;  %v2901_v48 = vld [vmem:[%s3933_s6 + $0x88] ss:$16 sps:$4 sm:$0xff]  }
 0x427   : >> { %v1020_v39 = vpack.c.bf16 %v988_v59, %v988_v59  ;;  %v1022_v60 = vpack.c.bf16 %v1006_v38, %v1006_v38  ;;  %v1021_v63 = vpack.c.bf16 %v997_v20, %v997_v20  ;;  %v1023_v43 = vpack.c.bf16 %v1015_v22, %v1015_v22  ;;  %v2904_v15 = vld [vmem:[%s3933_s6 + $0x288] ss:$16 sps:$4 sm:$0xff]   ;;  %v2909_v61 = vld [vmem:[%s3933_s6 + $0x6c] ss:$16 sps:$4 sm:$0xff]  }
 0x428   : >> { %v2912_v16 = vld [vmem:[%s3933_s6 + $0x26c] ss:$16 sps:$4 sm:$0xff]   ;;  %v2907_v54 = vld [vmem:[%s3933_s6 + $0x68] ss:$16 sps:$4 sm:$0xff]  }
 0x429   : >> { %v1439_v12 = vunpack.c.l.b16 %v1021_v63  ;;  %v1441_v21 = vunpack.c.l.b16 %v1023_v43  ;;  %v1438_v17 = vunpack.c.l.b16 %v1020_v39  ;;  %v1440_v28 = vunpack.c.l.b16 %v1022_v60  ;;  %v2910_v53 = vld [vmem:[%s3933_s6 + $0x268] ss:$16 sps:$4 sm:$0xff]   ;;  %v2915_v8 = vld [vmem:[%s3933_s6 + $0x4c] ss:$16 sps:$4 sm:$0xff]  }
 0x42a   : >> { %v2918_v9 = vld [vmem:[%s3933_s6 + $0x24c] ss:$16 sps:$4 sm:$0xff]   ;;  %v2913_v10 = vld [vmem:[%s3933_s6 + $0x48] ss:$16 sps:$4 sm:$0xff]  }
 0x42b   : >> { %v1443_v55 = vsel %vm686_vm4, %v1439_v12, %v1435_v3  ;;  %v1445_v56 = vsel %vm686_vm4, %v1441_v21, %v1437_v7  ;;  %v1442_v4 = vsel %vm686_vm4, %v1438_v17, %v1434_v5  ;;  %v1444_v29 = vsel %vm686_vm4, %v1440_v28, %v1436_v11  ;;  %v2916_v24 = vld [vmem:[%s3933_s6 + $0x248] ss:$16 sps:$4 sm:$0xff]   ;;  %v2921_v25 = vld [vmem:[%s3933_s6 + $0x2c] ss:$16 sps:$4 sm:$0xff]  }
 0x42c   : >> { %v1447_v41 = vpack.c.b16 %v1443_v55, %v1443_v55  ;;  %v1449_v57 = vpack.c.b16 %v1445_v56, %v1445_v56  ;;  %v3710_v51 = vpack.c.b16 %v1442_v4, %v1442_v4  ;;  %v3712_v52 = vpack.c.b16 %v1444_v29, %v1444_v29  ;;  %v2924_v27 = vld [vmem:[%s3933_s6 + $0x22c] ss:$16 sps:$4 sm:$0xff]   ;;  %v2919_v58 = vld [vmem:[%s3933_s6 + $0x28] ss:$16 sps:$4 sm:$0xff]  }
 0x42d   : >> { %v2922_v6 = vld [vmem:[%s3933_s6 + $0x228] ss:$16 sps:$4 sm:$0xff]   ;;  %v2927_v14 = vld [vmem:[%s3933_s6 + $0xc] ss:$16 sps:$4 sm:$0xff]  }
 0x42e   : >> { %2126 = vmatprep.mubr.bf16.mxu1 %v1447_v41  ;;  %2167 = vmatprep.mubr.bf16.mxu0 %v1449_v57  ;;  %v2930_v34 = vld [vmem:[%s3933_s6 + $0x20c] ss:$16 sps:$4 sm:$0xff]   ;;  %v2925_v35 = vld [vmem:[%s3933_s6 + $0x8] ss:$16 sps:$4 sm:$0xff]  }
 0x42f   : >> { %2127 = vmatmul.mubr.bf16.vlgmr.msra.gmra.mxu1 %v3710_v51  ;;  %2168 = vmatmul.mubr.bf16.vlgmr.msra.gmra.mxu0 %v3712_v52  ;;  %v2928_v36 = vld [vmem:[%s3933_s6 + $0x208] ss:$16 sps:$4 sm:$0xff]   ;;  %v2933_v59 = vld [vmem:[%s3933_s6 + $0x1ec] ss:$16 sps:$4 sm:$0xff]  }
 0x430   : >> { %2177 = vmatpush1.bf16.msra.mxu1 %v2883_v50  ;;  %2218 = vmatpush1.bf16.msra.mxu0 %v2886_v62  ;;  %v2936_v38 = vld [vmem:[%s3933_s6 + $0x3ec] ss:$16 sps:$4 sm:$0xff]   ;;  %v2931_v20 = vld [vmem:[%s3933_s6 + $0x1e8] ss:$16 sps:$4 sm:$0xff]  }
 0x431   : >> { %2208 = vmatprep.mubr.bf16.mxu1 %v1447_v41  ;;  %2249 = vmatprep.mubr.bf16.mxu0 %v1449_v57  ;;  %v2934_v22 = vld [vmem:[%s3933_s6 + $0x3e8] ss:$16 sps:$4 sm:$0xff]   ;;  %v2939_v39 = vld [vmem:[%s3933_s6 + $0x1cc] ss:$16 sps:$4 sm:$0xff]  }
 0x432   : >> { %2178 = vmatprep.subr.bf16.mxu1 %v2891_v30  ;;  %2219 = vmatprep.subr.bf16.mxu0 %v2894_v31  ;;  %v2942_v60 = vld [vmem:[%s3933_s6 + $0x3cc] ss:$16 sps:$4 sm:$0xff]   ;;  %v2937_v63 = vld [vmem:[%s3933_s6 + $0x1c8] ss:$16 sps:$4 sm:$0xff]  }
 0x433   : >> { %v2940_v43 = vld [vmem:[%s3933_s6 + $0x3c8] ss:$16 sps:$4 sm:$0xff]   ;;  %v2945_v3 = vld [vmem:[%s3933_s6 + $0x1ac] ss:$16 sps:$4 sm:$0xff]  }
 0x434   : >> { %2179 = vmatpush1.bf16.msra.mxu1 %v2889_v32  ;;  %2220 = vmatpush1.bf16.msra.mxu0 %v2892_v33  ;;  %v2948_v7 = vld [vmem:[%s3933_s6 + $0x3ac] ss:$16 sps:$4 sm:$0xff]   ;;  %v2943_v5 = vld [vmem:[%s3933_s6 + $0x1a8] ss:$16 sps:$4 sm:$0xff]  }
 0x435   : >> { %2180 = vmatprep.subr.bf16.mxu1 %v2897_v37  ;;  %2221 = vmatprep.subr.bf16.mxu0 %v2900_v18  ;;  %v2946_v11 = vld [vmem:[%s3933_s6 + $0x3a8] ss:$16 sps:$4 sm:$0xff]   ;;  %v2951_v12 = vld [vmem:[%s3933_s6 + $0x18c] ss:$16 sps:$4 sm:$0xff]  }
 0x436   : >> { %v2954_v21 = vld [vmem:[%s3933_s6 + $0x38c] ss:$16 sps:$4 sm:$0xff]   ;;  %v2949_v17 = vld [vmem:[%s3933_s6 + $0x188] ss:$16 sps:$4 sm:$0xff]  }
 0x437   : >> { %v2952_v28 = vld [vmem:[%s3933_s6 + $0x388] ss:$16 sps:$4 sm:$0xff]   ;;  %v2957_v55 = vld [vmem:[%s3933_s6 + $0x16c] ss:$16 sps:$4 sm:$0xff]  }
 0x438   : >> { %2181 = vmatpush1.bf16.msra.mxu1 %v2895_v23  ;;  %2222 = vmatpush1.bf16.msra.mxu0 %v2898_v40  ;;  %v2960_v56 = vld [vmem:[%s3933_s6 + $0x36c] ss:$16 sps:$4 sm:$0xff]   ;;  %v2955_v4 = vld [vmem:[%s3933_s6 + $0x168] ss:$16 sps:$4 sm:$0xff]  }
 0x439   : >> { %2182 = vmatprep.subr.bf16.mxu1 %v2903_v47  ;;  %2223 = vmatprep.subr.bf16.mxu0 %v2906_v13  ;;  %v2958_v29 = vld [vmem:[%s3933_s6 + $0x368] ss:$16 sps:$4 sm:$0xff]   ;;  %v2963_v41 = vld [vmem:[%s3933_s6 + $0x14c] ss:$16 sps:$4 sm:$0xff]  }
 0x43a   : >> { %v2966_v57 = vld [vmem:[%s3933_s6 + $0x34c] ss:$16 sps:$4 sm:$0xff]   ;;  %v2961_v50 = vld [vmem:[%s3933_s6 + $0x148] ss:$16 sps:$4 sm:$0xff]  }
 0x43b   : >> { %v2964_v62 = vld [vmem:[%s3933_s6 + $0x348] ss:$16 sps:$4 sm:$0xff]   ;;  %v2969_v30 = vld [vmem:[%s3933_s6 + $0x12c] ss:$16 sps:$4 sm:$0xff]  }
 0x43c   : >> { %2183 = vmatpush1.bf16.msra.mxu1 %v2901_v48  ;;  %2224 = vmatpush1.bf16.msra.mxu0 %v2904_v15  ;;  %v2972_v31 = vld [vmem:[%s3933_s6 + $0x32c] ss:$16 sps:$4 sm:$0xff]   ;;  %v2967_v32 = vld [vmem:[%s3933_s6 + $0x128] ss:$16 sps:$4 sm:$0xff]  }
 0x43d   : >> { %2184 = vmatprep.subr.bf16.mxu1 %v2909_v61  ;;  %2225 = vmatprep.subr.bf16.mxu0 %v2912_v16  ;;  %v2970_v33 = vld [vmem:[%s3933_s6 + $0x328] ss:$16 sps:$4 sm:$0xff]   ;;  %v2975_v37 = vld [vmem:[%s3933_s6 + $0x10c] ss:$16 sps:$4 sm:$0xff]  }
 0x43e   : >> { %v2978_v18 = vld [vmem:[%s3933_s6 + $0x30c] ss:$16 sps:$4 sm:$0xff]   ;;  %v2973_v23 = vld [vmem:[%s3933_s6 + $0x108] ss:$16 sps:$4 sm:$0xff]  }
 0x43f   : >> { %v2976_v40 = vld [vmem:[%s3933_s6 + $0x308] ss:$16 sps:$4 sm:$0xff]  }
 0x440   : >> { %2185 = vmatpush1.bf16.msra.mxu1 %v2907_v54  ;;  %2226 = vmatpush1.bf16.msra.mxu0 %v2910_v53 }
 0x441   : >> { %2186 = vmatprep.subr.bf16.mxu1 %v2915_v8  ;;  %2227 = vmatprep.subr.bf16.mxu0 %v2918_v9  ;;  %v3068_v8 = vmov 1983009808  }
 0x442   : >> { %v2265_v9 = vunpack.c.l.s4 %v3068_v8 }
 0x444   : >> { %2187 = vmatpush1.bf16.msra.mxu1 %v2913_v10  ;;  %2228 = vmatpush1.bf16.msra.mxu0 %v2916_v24  ;;  %v2266_v10 = vunpack.c.0.s8 %v2265_v9  ;;  %v2260_v24 = vld [vmem:[%s2259_s30] sm:$0xf] }
 0x445   : >> { %2188 = vmatprep.subr.bf16.mxu1 %v2921_v25  ;;  %2229 = vmatprep.subr.bf16.mxu0 %v2924_v27  ;;  %v2261_v25 = vunpack.c.l.bf16 %v2260_v24 }
 0x446   : >> { %v2269_v27 = vsub.s32 %v2266_v10, %v3195_v19 }
 0x448   : >> { %2189 = vmatpush1.bf16.msra.mxu1 %v2919_v58  ;;  %2230 = vmatpush1.bf16.msra.mxu0 %v2922_v6 }
 0x449   : >> { %2190 = vmatprep.subr.bf16.mxu1 %v2927_v14  ;;  %2231 = vmatprep.subr.bf16.mxu0 %v2930_v34 }
 0x44c   : >> { %2191 = vmatpush1.bf16.msra.mxu1 %v2925_v35  ;;  %2232 = vmatpush1.bf16.msra.mxu0 %v2928_v36  ;;  %v2296_v36 = vrot.slane %v3145_v1, %v3254_v44 }
 0x44d   : >> { %2192 = vmatprep.subr.bf16.mxu1 %v2933_v59  ;;  %2233 = vmatprep.subr.bf16.mxu0 %v2936_v38  ;;  %v2292_v38 = vrot.slane %v3145_v1, %v3203_v26 }
 0x450   : >> { %2193 = vmatpush2.bf16.msra.mxu1 %v2931_v20  ;;  %2234 = vmatpush2.bf16.msra.mxu0 %v2934_v22 }
 0x451   : >> { %2194 = vmatprep.subr.bf16.mxu1 %v2939_v39  ;;  %2235 = vmatprep.subr.bf16.mxu0 %v2942_v60 }
 0x454   : >> { %2195 = vmatpush2.bf16.msra.mxu1 %v2937_v63  ;;  %2236 = vmatpush2.bf16.msra.mxu0 %v2940_v43 }
 0x455   : >> { %2196 = vmatprep.subr.bf16.mxu1 %v2945_v3  ;;  %2237 = vmatprep.subr.bf16.mxu0 %v2948_v7 }
 0x458   : >> { %2197 = vmatpush2.bf16.msra.mxu1 %v2943_v5  ;;  %2238 = vmatpush2.bf16.msra.mxu0 %v2946_v11  ;;  %v2303_v11 = vsub.s32 3, %v3195_v19 }
 0x459   : >> { %2198 = vmatprep.subr.bf16.mxu1 %v2951_v12  ;;  %2239 = vmatprep.subr.bf16.mxu0 %v2954_v21 }
 0x45c   : >> { %2199 = vmatpush2.bf16.msra.mxu1 %v2949_v17  ;;  %2240 = vmatpush2.bf16.msra.mxu0 %v2952_v28 }
 0x45d   : >> { %2200 = vmatprep.subr.bf16.mxu1 %v2957_v55  ;;  %2241 = vmatprep.subr.bf16.mxu0 %v2960_v56 }
 0x460   : >> { %2201 = vmatpush2.bf16.msra.mxu1 %v2955_v4  ;;  %2242 = vmatpush2.bf16.msra.mxu0 %v2958_v29 }
 0x461   : >> { %2202 = vmatprep.subr.bf16.mxu1 %v2963_v41  ;;  %2243 = vmatprep.subr.bf16.mxu0 %v2966_v57 }
 0x464   : >> { %2203 = vmatpush2.bf16.msra.mxu1 %v2961_v50  ;;  %2244 = vmatpush2.bf16.msra.mxu0 %v2964_v62  ;;  %v2304_v62 = vrot.slane %v3145_v1, %v2303_v11 }
 0x465   : >> { %2204 = vmatprep.subr.bf16.mxu1 %v2969_v30  ;;  %2245 = vmatprep.subr.bf16.mxu0 %v2972_v31 }
 0x468   : >> { %2205 = vmatpush2.bf16.msra.mxu1 %v2967_v32  ;;  %2246 = vmatpush2.bf16.msra.mxu0 %v2970_v33 }
 0x469   : >> { %2206 = vmatprep.subr.bf16.mxu1 %v2975_v37  ;;  %2247 = vmatprep.subr.bf16.mxu0 %v2978_v18  ;;  %v425_v37 = vld [vmem:[#allocation3] sm:$0x3] }
 0x46c   : >> { %2207 = vmatpush2.bf16.msra.mxu1 %v2973_v23  ;;  %2248 = vmatpush2.bf16.msra.mxu0 %v2976_v40 }
 0x46f   : >> { %2209 = vmatmul.mubr.bf16.vlgmr.msra.gmra.mxu1 %v3710_v51  ;;  %2250 = vmatmul.mubr.bf16.vlgmr.msra.gmra.mxu0 %v3712_v52  ;;  %v2270_v51 = vrot.slane %v2261_v25, %v2269_v27 }
 0x471   : >> { %v2278_v14 = vcombine.high %v2270_v51, %v2270_v51 }
 0x4ef   : >> { %v2128_v47 = vpop.f32.mrf.mxu1  ;;  %v2169_v13 = vpop.f32.mrf.mxu0 }
 0x4f0   : >> { %v2129_v58 = vadd.f32 %v2128_v47, %v3606_v42  ;;  %v2299_v42 = vsub.s32 2, %v3195_v19 }
 0x4f1   : >> { %v2130_v48 = vpop.f32.mrf.mxu1  ;;  %v2171_v15 = vpop.f32.mrf.mxu0 }
 0x4f2   : >> { %v2131_v52 = vadd.f32 %v2130_v48, %v3610_v46  ;;  %v2170_v34 = vadd.f32 %v2169_v13, %v2129_v58  ;;  %v2263_v46 = vcombine.high %v2261_v25, %v2261_v25  ;;  %v2300_v26 = vrot.slane %v3145_v1, %v2299_v42 }
 0x4f3   : >> { %v2132_v61 = vpop.f32.mrf.mxu1  ;;  %v2173_v16 = vpop.f32.mrf.mxu0 }
 0x4f4   : >> { %v2172_v6 = vadd.f32 %v2171_v15, %v2131_v52  ;;  %v2284_v59 = vadd.f32 %v2270_v51, %v2170_v34  ;;  %v2277_v63 = vrot.slane %v2263_v46, %v2269_v27 }
 0x4f5   : >> { %v2133_v54 = vpop.f32.mrf.mxu1  ;;  %v2174_v53 = vpop.f32.mrf.mxu0 }
 0x4f6   : >> { %v2285_v35 = vadd.f32 %v2278_v14, %v2172_v6  ;;  %v2309_v22 = vadd.f32 %v2292_v38, %v2284_v59  ;;  %v2279_v56 = vcombine.high %v2277_v63, %v2277_v63 }
 0x4f8   : >> { %v2310_v20 = vadd.f32 %v2296_v36, %v2285_v35  ;;  %v2636_v60 = vmul.f32 -1.442695, %v2309_v22 }
 0x4fa   : >> { %v2637_v39 = vmul.f32 -1.442695, %v2310_v20 }
 0x4fc   : >> { %3015 = vpow2.f32 %v2637_v39 }
 0x4fd   : >> { %3017 = vpow2.f32 %v2636_v60 }
 0x509   : >> { %v3016_v43 = vpop.eup %3015 }
 0x50a   : >> { %v3018_v5 = vpop.eup %3017  ;;  %v2322_v17 = vadd.f32 1.0, %v3016_v43 }
 0x50b   : >> { %v2316_v4 = vadd.f32 1.0, %v3018_v5 }
 0x50c   : >> { %3019 = vrcp.f32 %v2322_v17 }
 0x50d   : >> { %3021 = vrcp.f32 %v2316_v4 }
 0x52f   : >> { %v2210_v3 = vpop.f32.mrf.mxu1  ;;  %v2251_v7 = vpop.f32.mrf.mxu0 }
 0x530   : >> { %v2211_v44 = vadd.f32 %v2210_v3, %v3608_v45 }
 0x531   : >> { %v2212_v12 = vpop.f32.mrf.mxu1  ;;  %v2253_v21 = vpop.f32.mrf.mxu0 }
 0x532   : >> { %v2252_v28 = vadd.f32 %v2251_v7, %v2211_v44  ;;  %v2213_v55 = vadd.f32 %v2212_v12, %v3620_v49  ;;  %v3020_v49 = vpop.eup %3019 }
 0x533   : >> { %v2214_v29 = vpop.f32.mrf.mxu1  ;;  %v2255_v41 = vpop.f32.mrf.mxu0  ;;  %v2332_v40 = vmul.f32 %v3020_v49, %v425_v37 }
 0x534   : >> { %v2286_v57 = vadd.f32 %v2277_v63, %v2252_v28  ;;  %v2254_v50 = vadd.f32 %v2253_v21, %v2213_v55  ;;  %v3022_v18 = vpop.eup %3021 }
 0x535   : >> { %v2215_v30 = vpop.f32.mrf.mxu1  ;;  %v2256_v45 = vpop.f32.mrf.mxu0 }
 0x536   : >> { %v2311_v19 = vadd.f32 %v2300_v26, %v2286_v57  ;;  %v2287_v31 = vadd.f32 %v2279_v56, %v2254_v50 }
 0x538   : >> { %3023 = vtanh.f32 %v2311_v19  ;;  %v2312_v32 = vadd.f32 %v2304_v62, %v2287_v31 }
 0x53a   : >> { %v2638_v33 = vmul.f32 -1.442695, %v2312_v32 }
 0x53c   : >> { %3025 = vpow2.f32 %v2638_v33 }
 0x545   : >> { %v3024_v23 = vpop.eup %3023 }
 0x546   : >> { %v2333_v47 = vmul.f32 %v3024_v23, %v3022_v18 }
 0x548   : >> { %v2334_v13 = vadd.f32 %v2333_v47, %v2332_v40 }
 0x549   : >> { %v3026_v48 = vpop.eup %3025 }
 0x54a   : >> { %2338 = vst [vmem:[#allocation3] sm:$0x3] %v2334_v13  ;;  %v2329_v15 = vadd.f32 1.0, %v3026_v48  ;;  %3027 = vtanh.f32 %v2334_v13 }
 0x54c   : >> { %3029 = vrcp.f32 %v2329_v15 }
 0x557   : >> { %v3028_v61 = vpop.eup %3027 }
 0x559   : >> { %v3030_v16 = vpop.eup %3029 }
 0x55a   : >> { %v2336_v54 = vmul.f32 %v3030_v16, %v3028_v61  ;;  %422 = sbr.rel (!%p420_p5) target bundleno = 18 (0x12), region = 101 }
 0x55c   : >> { %2337 = vst [vmem:[#allocation2] sm:$0x3] %v2336_v54  ;;  %v2339_v53 = vpack.c.bf16 %v2336_v54, %v2336_v54 }
 0x55e   : >> { %2341 = vst [vmem:[%s2340_s13] sm:$0x1] %v2339_v53 }
 0x55f PF: > { %s19_s11 = sadd.s32 1, %s3057_s11   ;;  %s3937_s30 = smov %s3053_s10 }
 0x560   : > { %p16_p6 = scmp.ge.s32.totalorder %s19_s11, 4   ;;  %s3938_s10 = smov %s3940_s12 }
 0x562   :  { %18 = sbr.rel (!%p16_p6) target bundleno = 2 (0x2), region = 112 }

</bundles_post_ra>
